<compile_context>
chip_gen: v6e
topology: v6e:2x2x1
jax: 0.10.0
libtpu: 0.0.40
codegen_flags: <defaults>
</compile_context>

<pallas_src>
import functools

import jax
import jax.numpy as jnp
from jax import lax
from jax.experimental import pallas as pl
from jax.experimental.pallas import tpu as pltpu


def embeddings_kernel(ids_ref, tok_hbm, pos_ref, gamma_ref, beta_ref,
                      o_ref, tok_buf, sem, *, eps, chunk, chunks_per_seq,
                      seq_len):
    # ids_ref:    SMEM (B*S,) int32      (scalar prefetch)
    # tok_hbm:    HBM  (V, H)            (vocab table; manual DMA gather)
    # pos_ref:    VMEM (chunk, H)        (position rows for this chunk, pipelined)
    # gamma/beta: VMEM (1, H)            (resident LayerNorm affine params)
    # o_ref:      VMEM (chunk, H)        (output tile)
    # tok_buf:    VMEM (2, chunk, H)     (double-buffered gathered token rows)
    # sem:        DMA sems (2,)          (one per buffer slot)
    b = pl.program_id(0)
    c = pl.program_id(1)
    slot = lax.rem(c, 2)

    def issue(chunk_idx, slot_idx):
        base = b * seq_len + chunk_idx * chunk
        for j in range(chunk):                      # static unroll
            tid = ids_ref[base + j]
            pltpu.make_async_copy(
                tok_hbm.at[pl.ds(tid, 1)],
                tok_buf.at[slot_idx, pl.ds(j, 1)],
                sem.at[slot_idx],
            ).start()

    # Prime this sequence's pipeline on its first chunk (slot 0).
    @pl.when(c == 0)
    def _prime():
        issue(0, 0)

    # Prefetch the NEXT chunk of this sequence into the other slot so its DMAs
    # overlap with the current chunk's compute.  Staying within the sequence
    # keeps the batch axis safe to mark "parallel" (each sequence self-primes).
    @pl.when(c + 1 < chunks_per_seq)
    def _prefetch_next():
        issue(c + 1, 1 - slot)

    # Wait for the current chunk's rows (shared per-slot semaphore, one wait per
    # row copy; statically unrolled).  Src in the wait descriptor is a dummy
    # slice of matching shape -- only dst/sem sizes matter for the wait.
    for j in range(chunk):
        pltpu.make_async_copy(
            tok_hbm.at[pl.ds(0, 1)],
            tok_buf.at[slot, pl.ds(j, 1)],
            sem.at[slot],
        ).wait()

    # ---- token + position embeddings, fused-stats LayerNorm in f32 ----------
    x = tok_buf[slot].astype(jnp.float32) + pos_ref[...].astype(jnp.float32)
    mean = jnp.mean(x, axis=-1, keepdims=True)
    mean_sq = jnp.mean(x * x, axis=-1, keepdims=True)
    var = mean_sq - mean * mean
    inv = lax.rsqrt(var + eps)                      # EUP
    y = (x - mean) * inv * gamma_ref[...].astype(jnp.float32) \
        + beta_ref[...].astype(jnp.float32)

    # Dropout: PyTorch eval()-mode identity.
    o_ref[...] = y.astype(o_ref.dtype)


def _pick_chunk(seq_len, max_chunk):
    """Largest multiple of 8 that divides seq_len, capped at max_chunk."""
    for t in range(min(seq_len, max_chunk), 7, -1):
        if seq_len % t == 0 and t % 8 == 0:
            return t
    return seq_len


def embeddings_forward(input_ids, tok_table, pos_table, gamma, beta, *,
                       eps=1e-12, max_chunk=64):
    """input_ids: [B, S] int; tok_table: [V, H]; pos_table: [P>=S, H]; gamma/beta: [H]."""
    B, S = input_ids.shape
    V, H = tok_table.shape
    assert pos_table.shape[0] >= S, "sequence longer than max_position_embeddings"
    assert S % 8 == 0, "pad the sequence length to a multiple of 8"

    chunk = _pick_chunk(S, max_chunk)
    C = S // chunk                                  # chunks per sequence

    ids_flat = input_ids.reshape(B * S).astype(jnp.int32)
    pos_block = pos_table[:S]                       # rows used by every sequence
    gamma2 = gamma.reshape(1, H)
    beta2 = beta.reshape(1, H)

    kernel = functools.partial(embeddings_kernel, eps=eps, chunk=chunk,
                               chunks_per_seq=C, seq_len=S)

    itemsize = jnp.dtype(tok_table.dtype).itemsize
    cost = pl.CostEstimate(
        flops=10 * B * S * H,                       # add + fused-stat layernorm
        transcendentals=B * S,                      # one rsqrt per token
        bytes_accessed=int((2 * B * S * H            # gathered rows + output
                            + B * S * H              # position rows (re-fetched per batch)
                            + 2 * H) * itemsize      # gamma/beta
                           + 4 * B * S),             # ids
    )

    out2d = pl.pallas_call(
        kernel,
        out_shape=jax.ShapeDtypeStruct((B * S, H), tok_table.dtype),
        grid_spec=pltpu.PrefetchScalarGridSpec(
            num_scalar_prefetch=1,
            grid=(B, C),
            in_specs=[
                pl.BlockSpec(memory_space=pl.ANY),                     # vocab table in HBM
                pl.BlockSpec((chunk, H), lambda b, c, ids: (c, 0)),    # pos rows for chunk
                pl.BlockSpec((1, H), lambda b, c, ids: (0, 0)),        # gamma (resident)
                pl.BlockSpec((1, H), lambda b, c, ids: (0, 0)),        # beta (resident)
            ],
            out_specs=pl.BlockSpec((chunk, H),
                                   lambda b, c, ids: (b * C + c, 0)),
            scratch_shapes=[
                pltpu.VMEM((2, chunk, H), tok_table.dtype),            # double buffer
                pltpu.SemaphoreType.DMA((2,)),                         # one sem per slot
            ],
        ),
        compiler_params=pltpu.CompilerParams(
            dimension_semantics=("parallel", "arbitrary"),
            vmem_limit_bytes=32 * 1024 * 1024,     # safe on v5e/v6e/v7x; footprint is tiny
        ),
        cost_estimate=cost,
    )(ids_flat, tok_table, pos_block, gamma2, beta2)

    return out2d.reshape(B, S, H)


def embeddings_ref(input_ids, tok_table, pos_table, gamma, beta, eps=1e-12):
    S = input_ids.shape[-1]
    tok = tok_table[input_ids]                       # (B, S, H)
    pos = pos_table[:S][None, :, :]                  # (1, S, H)
    x = tok + pos
    mean = jnp.mean(x, axis=-1, keepdims=True)
    var = jnp.mean((x - mean) ** 2, axis=-1, keepdims=True)
    return (x - mean) / jnp.sqrt(var + eps) * gamma + beta


if __name__ == "__main__":
    # Small, TPU-tile-friendly stand-ins for BERT's vocab/hidden/max-positions.
    batch, seq, hidden = 2, 16, 128
    vocab, max_pos = 64, 32

    key = jax.random.PRNGKey(0)
    kid, ktok, kpos, kg, kb = jax.random.split(key, 5)

    input_ids = jax.random.randint(kid, (batch, seq), 0, vocab, dtype=jnp.int32)
    tok_table = jax.random.normal(ktok, (vocab, hidden), jnp.float32)
    pos_table = jax.random.normal(kpos, (max_pos, hidden), jnp.float32)
    gamma = 1.0 + 0.1 * jax.random.normal(kg, (hidden,), jnp.float32)
    beta = 0.01 * jax.random.normal(kb, (hidden,), jnp.float32)

    ref = embeddings_ref(input_ids, tok_table, pos_table, gamma, beta)

    # Single-chunk path (chunk == S, prime-only).
    out1 = jax.jit(embeddings_forward)(input_ids, tok_table, pos_table, gamma, beta)
    out1 = jax.block_until_ready(out1)
    assert out1.shape == (batch, seq, hidden)
    assert jnp.allclose(out1, ref, atol=1e-4, rtol=1e-4), "mismatch (single-chunk)"

    # Multi-chunk path (chunk=8 -> 2 chunks/seq, exercises cross-step prefetch).
    out2 = jax.jit(functools.partial(embeddings_forward, max_chunk=8))(
        input_ids, tok_table, pos_table, gamma, beta)
    out2 = jax.block_until_ready(out2)
    assert jnp.allclose(out2, ref, atol=1e-4, rtol=1e-4), "mismatch (multi-chunk)"

    print("KERNEL_OK")
</pallas_src>

<mosaic_0001>
module attributes {stable_mosaic.version = 11 : i64} {
  func.func @embeddings_kernel(%arg0: i32, %arg1: i32, %arg2: memref<32xi32, #tpu.memory_space<smem>>, %arg3: memref<64x128xf32, #tpu.memory_space<any>>, %arg4: memref<16x128xf32, #tpu.memory_space<vmem>>, %arg5: memref<1x128xf32, #tpu.memory_space<vmem>>, %arg6: memref<1x128xf32, #tpu.memory_space<vmem>>, %arg7: memref<16x128xf32, #tpu.memory_space<vmem>>, %arg8: memref<2x16x128xf32, #tpu.memory_space<vmem>>, %arg9: memref<2x!tpu.dma_semaphore, #tpu.memory_space<semaphore_mem>>) attributes {dimension_semantics = [#tpu.dimension_semantics<parallel>, #tpu.dimension_semantics<arbitrary>], iteration_bounds = array<i64: 2, 1>, scalar_prefetch = 1 : i64, scratch_operands = 2 : i64, tpu.core_type = #tpu.core_type<tc>, window_params = [{}, {transform_indices = @transform_1, window_bounds = array<i64: 16, 128>}, {pipeline_mode = #tpu.pipeline_mode<synchronous>, transform_indices = @transform_2, window_bounds = array<i64: 1, 128>}, {pipeline_mode = #tpu.pipeline_mode<synchronous>, transform_indices = @transform_3, window_bounds = array<i64: 1, 128>}, {transform_indices = @transform_4, window_bounds = array<i64: 16, 128>}]} {
    %c2_i32 = arith.constant 2 : i32
    %0 = arith.remsi %arg1, %c2_i32 : i32
    %c0_i32 = arith.constant 0 : i32
    %1 = arith.cmpi eq, %arg1, %c0_i32 : i32
    %2 = arith.extui %1 : i1 to i32
    %c0_i32_0 = arith.constant 0 : i32
    %3 = arith.cmpi ne, %2, %c0_i32_0 : i32
    scf.if %3 {
      %c16_i32 = arith.constant 16 : i32
      %118 = arith.muli %arg0, %c16_i32 : i32
      %c0_i32_67 = arith.constant 0 : i32
      %119 = arith.addi %118, %c0_i32_67 : i32
      %c0_i32_68 = arith.constant 0 : i32
      %120 = arith.addi %119, %c0_i32_68 : i32
      %121 = arith.index_cast %120 : i32 to index
      %122 = memref.load %arg2[%121] : memref<32xi32, #tpu.memory_space<smem>>
      %c0_i32_69 = arith.constant 0 : i32
      %c0_i32_70 = arith.constant 0 : i32
      %c0_i32_71 = arith.constant 0 : i32
      %123 = tpu.memref_slice %arg3[%122, %c0_i32_71] : memref<64x128xf32, #tpu.memory_space<any>> -> memref<1x128xf32, #tpu.memory_space<any>>
      %c0_i32_72 = arith.constant 0 : i32
      %c0_i32_73 = arith.constant 0 : i32
      %124 = tpu.memref_slice %arg8[%c0_i32_69, %c0_i32_72, %c0_i32_73] : memref<2x16x128xf32, #tpu.memory_space<vmem>> -> memref<1x1x128xf32, #tpu.memory_space<vmem>>
      %125 = tpu.memref_squeeze %124 : memref<1x1x128xf32, #tpu.memory_space<vmem>> -> memref<1x128xf32, #tpu.memory_space<vmem>>
      %126 = tpu.memref_slice %arg9[%c0_i32_70] : memref<2x!tpu.dma_semaphore, #tpu.memory_space<semaphore_mem>> -> memref<1x!tpu.dma_semaphore, #tpu.memory_space<semaphore_mem>>
      %127 = tpu.memref_squeeze %126 : memref<1x!tpu.dma_semaphore, #tpu.memory_space<semaphore_mem>> -> memref<!tpu.dma_semaphore, #tpu.memory_space<semaphore_mem>>
      tpu.enqueue_dma source(%123 : memref<1x128xf32, #tpu.memory_space<any>>) target(%125 : memref<1x128xf32, #tpu.memory_space<vmem>>) target_semaphore(%127 : memref<!tpu.dma_semaphore, #tpu.memory_space<semaphore_mem>>)
      %c1_i32_74 = arith.constant 1 : i32
      %128 = arith.addi %119, %c1_i32_74 : i32
      %129 = arith.index_cast %128 : i32 to index
      %130 = memref.load %arg2[%129] : memref<32xi32, #tpu.memory_space<smem>>
      %c0_i32_75 = arith.constant 0 : i32
      %c0_i32_76 = arith.constant 0 : i32
      %c0_i32_77 = arith.constant 0 : i32
      %131 = tpu.memref_slice %arg3[%130, %c0_i32_77] : memref<64x128xf32, #tpu.memory_space<any>> -> memref<1x128xf32, #tpu.memory_space<any>>
      %c1_i32_78 = arith.constant 1 : i32
      %c0_i32_79 = arith.constant 0 : i32
      %132 = tpu.memref_slice %arg8[%c0_i32_75, %c1_i32_78, %c0_i32_79] : memref<2x16x128xf32, #tpu.memory_space<vmem>> -> memref<1x1x128xf32, #tpu.memory_space<vmem>>
      %133 = tpu.memref_squeeze %132 : memref<1x1x128xf32, #tpu.memory_space<vmem>> -> memref<1x128xf32, #tpu.memory_space<vmem>>
      %134 = tpu.memref_slice %arg9[%c0_i32_76] : memref<2x!tpu.dma_semaphore, #tpu.memory_space<semaphore_mem>> -> memref<1x!tpu.dma_semaphore, #tpu.memory_space<semaphore_mem>>
      %135 = tpu.memref_squeeze %134 : memref<1x!tpu.dma_semaphore, #tpu.memory_space<semaphore_mem>> -> memref<!tpu.dma_semaphore, #tpu.memory_space<semaphore_mem>>
      tpu.enqueue_dma source(%131 : memref<1x128xf32, #tpu.memory_space<any>>) target(%133 : memref<1x128xf32, #tpu.memory_space<vmem>>) target_semaphore(%135 : memref<!tpu.dma_semaphore, #tpu.memory_space<semaphore_mem>>)
      %c2_i32_80 = arith.constant 2 : i32
      %136 = arith.addi %119, %c2_i32_80 : i32
      %137 = arith.index_cast %136 : i32 to index
      %138 = memref.load %arg2[%137] : memref<32xi32, #tpu.memory_space<smem>>
      %c0_i32_81 = arith.constant 0 : i32
      %c0_i32_82 = arith.constant 0 : i32
      %c0_i32_83 = arith.constant 0 : i32
      %139 = tpu.memref_slice %arg3[%138, %c0_i32_83] : memref<64x128xf32, #tpu.memory_space<any>> -> memref<1x128xf32, #tpu.memory_space<any>>
      %c2_i32_84 = arith.constant 2 : i32
      %c0_i32_85 = arith.constant 0 : i32
      %140 = tpu.memref_slice %arg8[%c0_i32_81, %c2_i32_84, %c0_i32_85] : memref<2x16x128xf32, #tpu.memory_space<vmem>> -> memref<1x1x128xf32, #tpu.memory_space<vmem>>
      %141 = tpu.memref_squeeze %140 : memref<1x1x128xf32, #tpu.memory_space<vmem>> -> memref<1x128xf32, #tpu.memory_space<vmem>>
      %142 = tpu.memref_slice %arg9[%c0_i32_82] : memref<2x!tpu.dma_semaphore, #tpu.memory_space<semaphore_mem>> -> memref<1x!tpu.dma_semaphore, #tpu.memory_space<semaphore_mem>>
      %143 = tpu.memref_squeeze %142 : memref<1x!tpu.dma_semaphore, #tpu.memory_space<semaphore_mem>> -> memref<!tpu.dma_semaphore, #tpu.memory_space<semaphore_mem>>
      tpu.enqueue_dma source(%139 : memref<1x128xf32, #tpu.memory_space<any>>) target(%141 : memref<1x128xf32, #tpu.memory_space<vmem>>) target_semaphore(%143 : memref<!tpu.dma_semaphore, #tpu.memory_space<semaphore_mem>>)
      %c3_i32_86 = arith.constant 3 : i32
      %144 = arith.addi %119, %c3_i32_86 : i32
      %145 = arith.index_cast %144 : i32 to index
      %146 = memref.load %arg2[%145] : memref<32xi32, #tpu.memory_space<smem>>
      %c0_i32_87 = arith.constant 0 : i32
      %c0_i32_88 = arith.constant 0 : i32
      %c0_i32_89 = arith.constant 0 : i32
      %147 = tpu.memref_slice %arg3[%146, %c0_i32_89] : memref<64x128xf32, #tpu.memory_space<any>> -> memref<1x128xf32, #tpu.memory_space<any>>
      %c3_i32_90 = arith.constant 3 : i32
      %c0_i32_91 = arith.constant 0 : i32
      %148 = tpu.memref_slice %arg8[%c0_i32_87, %c3_i32_90, %c0_i32_91] : memref<2x16x128xf32, #tpu.memory_space<vmem>> -> memref<1x1x128xf32, #tpu.memory_space<vmem>>
      %149 = tpu.memref_squeeze %148 : memref<1x1x128xf32, #tpu.memory_space<vmem>> -> memref<1x128xf32, #tpu.memory_space<vmem>>
      %150 = tpu.memref_slice %arg9[%c0_i32_88] : memref<2x!tpu.dma_semaphore, #tpu.memory_space<semaphore_mem>> -> memref<1x!tpu.dma_semaphore, #tpu.memory_space<semaphore_mem>>
      %151 = tpu.memref_squeeze %150 : memref<1x!tpu.dma_semaphore, #tpu.memory_space<semaphore_mem>> -> memref<!tpu.dma_semaphore, #tpu.memory_space<semaphore_mem>>
      tpu.enqueue_dma source(%147 : memref<1x128xf32, #tpu.memory_space<any>>) target(%149 : memref<1x128xf32, #tpu.memory_space<vmem>>) target_semaphore(%151 : memref<!tpu.dma_semaphore, #tpu.memory_space<semaphore_mem>>)
      %c4_i32_92 = arith.constant 4 : i32
      %152 = arith.addi %119, %c4_i32_92 : i32
      %153 = arith.index_cast %152 : i32 to index
      %154 = memref.load %arg2[%153] : memref<32xi32, #tpu.memory_space<smem>>
      %c0_i32_93 = arith.constant 0 : i32
      %c0_i32_94 = arith.constant 0 : i32
      %c0_i32_95 = arith.constant 0 : i32
      %155 = tpu.memref_slice %arg3[%154, %c0_i32_95] : memref<64x128xf32, #tpu.memory_space<any>> -> memref<1x128xf32, #tpu.memory_space<any>>
      %c4_i32_96 = arith.constant 4 : i32
      %c0_i32_97 = arith.constant 0 : i32
      %156 = tpu.memref_slice %arg8[%c0_i32_93, %c4_i32_96, %c0_i32_97] : memref<2x16x128xf32, #tpu.memory_space<vmem>> -> memref<1x1x128xf32, #tpu.memory_space<vmem>>
      %157 = tpu.memref_squeeze %156 : memref<1x1x128xf32, #tpu.memory_space<vmem>> -> memref<1x128xf32, #tpu.memory_space<vmem>>
      %158 = tpu.memref_slice %arg9[%c0_i32_94] : memref<2x!tpu.dma_semaphore, #tpu.memory_space<semaphore_mem>> -> memref<1x!tpu.dma_semaphore, #tpu.memory_space<semaphore_mem>>
      %159 = tpu.memref_squeeze %158 : memref<1x!tpu.dma_semaphore, #tpu.memory_space<semaphore_mem>> -> memref<!tpu.dma_semaphore, #tpu.memory_space<semaphore_mem>>
      tpu.enqueue_dma source(%155 : memref<1x128xf32, #tpu.memory_space<any>>) target(%157 : memref<1x128xf32, #tpu.memory_space<vmem>>) target_semaphore(%159 : memref<!tpu.dma_semaphore, #tpu.memory_space<semaphore_mem>>)
      %c5_i32_98 = arith.constant 5 : i32
      %160 = arith.addi %119, %c5_i32_98 : i32
      %161 = arith.index_cast %160 : i32 to index
      %162 = memref.load %arg2[%161] : memref<32xi32, #tpu.memory_space<smem>>
      %c0_i32_99 = arith.constant 0 : i32
      %c0_i32_100 = arith.constant 0 : i32
      %c0_i32_101 = arith.constant 0 : i32
      %163 = tpu.memref_slice %arg3[%162, %c0_i32_101] : memref<64x128xf32, #tpu.memory_space<any>> -> memref<1x128xf32, #tpu.memory_space<any>>
      %c5_i32_102 = arith.constant 5 : i32
      %c0_i32_103 = arith.constant 0 : i32
      %164 = tpu.memref_slice %arg8[%c0_i32_99, %c5_i32_102, %c0_i32_103] : memref<2x16x128xf32, #tpu.memory_space<vmem>> -> memref<1x1x128xf32, #tpu.memory_space<vmem>>
      %165 = tpu.memref_squeeze %164 : memref<1x1x128xf32, #tpu.memory_space<vmem>> -> memref<1x128xf32, #tpu.memory_space<vmem>>
      %166 = tpu.memref_slice %arg9[%c0_i32_100] : memref<2x!tpu.dma_semaphore, #tpu.memory_space<semaphore_mem>> -> memref<1x!tpu.dma_semaphore, #tpu.memory_space<semaphore_mem>>
      %167 = tpu.memref_squeeze %166 : memref<1x!tpu.dma_semaphore, #tpu.memory_space<semaphore_mem>> -> memref<!tpu.dma_semaphore, #tpu.memory_space<semaphore_mem>>
      tpu.enqueue_dma source(%163 : memref<1x128xf32, #tpu.memory_space<any>>) target(%165 : memref<1x128xf32, #tpu.memory_space<vmem>>) target_semaphore(%167 : memref<!tpu.dma_semaphore, #tpu.memory_space<semaphore_mem>>)
      %c6_i32_104 = arith.constant 6 : i32
      %168 = arith.addi %119, %c6_i32_104 : i32
      %169 = arith.index_cast %168 : i32 to index
      %170 = memref.load %arg2[%169] : memref<32xi32, #tpu.memory_space<smem>>
      %c0_i32_105 = arith.constant 0 : i32
      %c0_i32_106 = arith.constant 0 : i32
      %c0_i32_107 = arith.constant 0 : i32
      %171 = tpu.memref_slice %arg3[%170, %c0_i32_107] : memref<64x128xf32, #tpu.memory_space<any>> -> memref<1x128xf32, #tpu.memory_space<any>>
      %c6_i32_108 = arith.constant 6 : i32
      %c0_i32_109 = arith.constant 0 : i32
      %172 = tpu.memref_slice %arg8[%c0_i32_105, %c6_i32_108, %c0_i32_109] : memref<2x16x128xf32, #tpu.memory_space<vmem>> -> memref<1x1x128xf32, #tpu.memory_space<vmem>>
      %173 = tpu.memref_squeeze %172 : memref<1x1x128xf32, #tpu.memory_space<vmem>> -> memref<1x128xf32, #tpu.memory_space<vmem>>
      %174 = tpu.memref_slice %arg9[%c0_i32_106] : memref<2x!tpu.dma_semaphore, #tpu.memory_space<semaphore_mem>> -> memref<1x!tpu.dma_semaphore, #tpu.memory_space<semaphore_mem>>
      %175 = tpu.memref_squeeze %174 : memref<1x!tpu.dma_semaphore, #tpu.memory_space<semaphore_mem>> -> memref<!tpu.dma_semaphore, #tpu.memory_space<semaphore_mem>>
      tpu.enqueue_dma source(%171 : memref<1x128xf32, #tpu.memory_space<any>>) target(%173 : memref<1x128xf32, #tpu.memory_space<vmem>>) target_semaphore(%175 : memref<!tpu.dma_semaphore, #tpu.memory_space<semaphore_mem>>)
      %c7_i32_110 = arith.constant 7 : i32
      %176 = arith.addi %119, %c7_i32_110 : i32
      %177 = arith.index_cast %176 : i32 to index
      %178 = memref.load %arg2[%177] : memref<32xi32, #tpu.memory_space<smem>>
      %c0_i32_111 = arith.constant 0 : i32
      %c0_i32_112 = arith.constant 0 : i32
      %c0_i32_113 = arith.constant 0 : i32
      %179 = tpu.memref_slice %arg3[%178, %c0_i32_113] : memref<64x128xf32, #tpu.memory_space<any>> -> memref<1x128xf32, #tpu.memory_space<any>>
      %c7_i32_114 = arith.constant 7 : i32
      %c0_i32_115 = arith.constant 0 : i32
      %180 = tpu.memref_slice %arg8[%c0_i32_111, %c7_i32_114, %c0_i32_115] : memref<2x16x128xf32, #tpu.memory_space<vmem>> -> memref<1x1x128xf32, #tpu.memory_space<vmem>>
      %181 = tpu.memref_squeeze %180 : memref<1x1x128xf32, #tpu.memory_space<vmem>> -> memref<1x128xf32, #tpu.memory_space<vmem>>
      %182 = tpu.memref_slice %arg9[%c0_i32_112] : memref<2x!tpu.dma_semaphore, #tpu.memory_space<semaphore_mem>> -> memref<1x!tpu.dma_semaphore, #tpu.memory_space<semaphore_mem>>
      %183 = tpu.memref_squeeze %182 : memref<1x!tpu.dma_semaphore, #tpu.memory_space<semaphore_mem>> -> memref<!tpu.dma_semaphore, #tpu.memory_space<semaphore_mem>>
      tpu.enqueue_dma source(%179 : memref<1x128xf32, #tpu.memory_space<any>>) target(%181 : memref<1x128xf32, #tpu.memory_space<vmem>>) target_semaphore(%183 : memref<!tpu.dma_semaphore, #tpu.memory_space<semaphore_mem>>)
      %c8_i32_116 = arith.constant 8 : i32
      %184 = arith.addi %119, %c8_i32_116 : i32
      %185 = arith.index_cast %184 : i32 to index
      %186 = memref.load %arg2[%185] : memref<32xi32, #tpu.memory_space<smem>>
      %c0_i32_117 = arith.constant 0 : i32
      %c0_i32_118 = arith.constant 0 : i32
      %c0_i32_119 = arith.constant 0 : i32
      %187 = tpu.memref_slice %arg3[%186, %c0_i32_119] : memref<64x128xf32, #tpu.memory_space<any>> -> memref<1x128xf32, #tpu.memory_space<any>>
      %c8_i32_120 = arith.constant 8 : i32
      %c0_i32_121 = arith.constant 0 : i32
      %188 = tpu.memref_slice %arg8[%c0_i32_117, %c8_i32_120, %c0_i32_121] : memref<2x16x128xf32, #tpu.memory_space<vmem>> -> memref<1x1x128xf32, #tpu.memory_space<vmem>>
      %189 = tpu.memref_squeeze %188 : memref<1x1x128xf32, #tpu.memory_space<vmem>> -> memref<1x128xf32, #tpu.memory_space<vmem>>
      %190 = tpu.memref_slice %arg9[%c0_i32_118] : memref<2x!tpu.dma_semaphore, #tpu.memory_space<semaphore_mem>> -> memref<1x!tpu.dma_semaphore, #tpu.memory_space<semaphore_mem>>
      %191 = tpu.memref_squeeze %190 : memref<1x!tpu.dma_semaphore, #tpu.memory_space<semaphore_mem>> -> memref<!tpu.dma_semaphore, #tpu.memory_space<semaphore_mem>>
      tpu.enqueue_dma source(%187 : memref<1x128xf32, #tpu.memory_space<any>>) target(%189 : memref<1x128xf32, #tpu.memory_space<vmem>>) target_semaphore(%191 : memref<!tpu.dma_semaphore, #tpu.memory_space<semaphore_mem>>)
      %c9_i32_122 = arith.constant 9 : i32
      %192 = arith.addi %119, %c9_i32_122 : i32
      %193 = arith.index_cast %192 : i32 to index
      %194 = memref.load %arg2[%193] : memref<32xi32, #tpu.memory_space<smem>>
      %c0_i32_123 = arith.constant 0 : i32
      %c0_i32_124 = arith.constant 0 : i32
      %c0_i32_125 = arith.constant 0 : i32
      %195 = tpu.memref_slice %arg3[%194, %c0_i32_125] : memref<64x128xf32, #tpu.memory_space<any>> -> memref<1x128xf32, #tpu.memory_space<any>>
      %c9_i32_126 = arith.constant 9 : i32
      %c0_i32_127 = arith.constant 0 : i32
      %196 = tpu.memref_slice %arg8[%c0_i32_123, %c9_i32_126, %c0_i32_127] : memref<2x16x128xf32, #tpu.memory_space<vmem>> -> memref<1x1x128xf32, #tpu.memory_space<vmem>>
      %197 = tpu.memref_squeeze %196 : memref<1x1x128xf32, #tpu.memory_space<vmem>> -> memref<1x128xf32, #tpu.memory_space<vmem>>
      %198 = tpu.memref_slice %arg9[%c0_i32_124] : memref<2x!tpu.dma_semaphore, #tpu.memory_space<semaphore_mem>> -> memref<1x!tpu.dma_semaphore, #tpu.memory_space<semaphore_mem>>
      %199 = tpu.memref_squeeze %198 : memref<1x!tpu.dma_semaphore, #tpu.memory_space<semaphore_mem>> -> memref<!tpu.dma_semaphore, #tpu.memory_space<semaphore_mem>>
      tpu.enqueue_dma source(%195 : memref<1x128xf32, #tpu.memory_space<any>>) target(%197 : memref<1x128xf32, #tpu.memory_space<vmem>>) target_semaphore(%199 : memref<!tpu.dma_semaphore, #tpu.memory_space<semaphore_mem>>)
      %c10_i32_128 = arith.constant 10 : i32
      %200 = arith.addi %119, %c10_i32_128 : i32
      %201 = arith.index_cast %200 : i32 to index
      %202 = memref.load %arg2[%201] : memref<32xi32, #tpu.memory_space<smem>>
      %c0_i32_129 = arith.constant 0 : i32
      %c0_i32_130 = arith.constant 0 : i32
      %c0_i32_131 = arith.constant 0 : i32
      %203 = tpu.memref_slice %arg3[%202, %c0_i32_131] : memref<64x128xf32, #tpu.memory_space<any>> -> memref<1x128xf32, #tpu.memory_space<any>>
      %c10_i32_132 = arith.constant 10 : i32
      %c0_i32_133 = arith.constant 0 : i32
      %204 = tpu.memref_slice %arg8[%c0_i32_129, %c10_i32_132, %c0_i32_133] : memref<2x16x128xf32, #tpu.memory_space<vmem>> -> memref<1x1x128xf32, #tpu.memory_space<vmem>>
      %205 = tpu.memref_squeeze %204 : memref<1x1x128xf32, #tpu.memory_space<vmem>> -> memref<1x128xf32, #tpu.memory_space<vmem>>
      %206 = tpu.memref_slice %arg9[%c0_i32_130] : memref<2x!tpu.dma_semaphore, #tpu.memory_space<semaphore_mem>> -> memref<1x!tpu.dma_semaphore, #tpu.memory_space<semaphore_mem>>
      %207 = tpu.memref_squeeze %206 : memref<1x!tpu.dma_semaphore, #tpu.memory_space<semaphore_mem>> -> memref<!tpu.dma_semaphore, #tpu.memory_space<semaphore_mem>>
      tpu.enqueue_dma source(%203 : memref<1x128xf32, #tpu.memory_space<any>>) target(%205 : memref<1x128xf32, #tpu.memory_space<vmem>>) target_semaphore(%207 : memref<!tpu.dma_semaphore, #tpu.memory_space<semaphore_mem>>)
      %c11_i32_134 = arith.constant 11 : i32
      %208 = arith.addi %119, %c11_i32_134 : i32
      %209 = arith.index_cast %208 : i32 to index
      %210 = memref.load %arg2[%209] : memref<32xi32, #tpu.memory_space<smem>>
      %c0_i32_135 = arith.constant 0 : i32
      %c0_i32_136 = arith.constant 0 : i32
      %c0_i32_137 = arith.constant 0 : i32
      %211 = tpu.memref_slice %arg3[%210, %c0_i32_137] : memref<64x128xf32, #tpu.memory_space<any>> -> memref<1x128xf32, #tpu.memory_space<any>>
      %c11_i32_138 = arith.constant 11 : i32
      %c0_i32_139 = arith.constant 0 : i32
      %212 = tpu.memref_slice %arg8[%c0_i32_135, %c11_i32_138, %c0_i32_139] : memref<2x16x128xf32, #tpu.memory_space<vmem>> -> memref<1x1x128xf32, #tpu.memory_space<vmem>>
      %213 = tpu.memref_squeeze %212 : memref<1x1x128xf32, #tpu.memory_space<vmem>> -> memref<1x128xf32, #tpu.memory_space<vmem>>
      %214 = tpu.memref_slice %arg9[%c0_i32_136] : memref<2x!tpu.dma_semaphore, #tpu.memory_space<semaphore_mem>> -> memref<1x!tpu.dma_semaphore, #tpu.memory_space<semaphore_mem>>
      %215 = tpu.memref_squeeze %214 : memref<1x!tpu.dma_semaphore, #tpu.memory_space<semaphore_mem>> -> memref<!tpu.dma_semaphore, #tpu.memory_space<semaphore_mem>>
      tpu.enqueue_dma source(%211 : memref<1x128xf32, #tpu.memory_space<any>>) target(%213 : memref<1x128xf32, #tpu.memory_space<vmem>>) target_semaphore(%215 : memref<!tpu.dma_semaphore, #tpu.memory_space<semaphore_mem>>)
      %c12_i32_140 = arith.constant 12 : i32
      %216 = arith.addi %119, %c12_i32_140 : i32
      %217 = arith.index_cast %216 : i32 to index
      %218 = memref.load %arg2[%217] : memref<32xi32, #tpu.memory_space<smem>>
      %c0_i32_141 = arith.constant 0 : i32
      %c0_i32_142 = arith.constant 0 : i32
      %c0_i32_143 = arith.constant 0 : i32
      %219 = tpu.memref_slice %arg3[%218, %c0_i32_143] : memref<64x128xf32, #tpu.memory_space<any>> -> memref<1x128xf32, #tpu.memory_space<any>>
      %c12_i32_144 = arith.constant 12 : i32
      %c0_i32_145 = arith.constant 0 : i32
      %220 = tpu.memref_slice %arg8[%c0_i32_141, %c12_i32_144, %c0_i32_145] : memref<2x16x128xf32, #tpu.memory_space<vmem>> -> memref<1x1x128xf32, #tpu.memory_space<vmem>>
      %221 = tpu.memref_squeeze %220 : memref<1x1x128xf32, #tpu.memory_space<vmem>> -> memref<1x128xf32, #tpu.memory_space<vmem>>
      %222 = tpu.memref_slice %arg9[%c0_i32_142] : memref<2x!tpu.dma_semaphore, #tpu.memory_space<semaphore_mem>> -> memref<1x!tpu.dma_semaphore, #tpu.memory_space<semaphore_mem>>
      %223 = tpu.memref_squeeze %222 : memref<1x!tpu.dma_semaphore, #tpu.memory_space<semaphore_mem>> -> memref<!tpu.dma_semaphore, #tpu.memory_space<semaphore_mem>>
      tpu.enqueue_dma source(%219 : memref<1x128xf32, #tpu.memory_space<any>>) target(%221 : memref<1x128xf32, #tpu.memory_space<vmem>>) target_semaphore(%223 : memref<!tpu.dma_semaphore, #tpu.memory_space<semaphore_mem>>)
      %c13_i32_146 = arith.constant 13 : i32
      %224 = arith.addi %119, %c13_i32_146 : i32
      %225 = arith.index_cast %224 : i32 to index
      %226 = memref.load %arg2[%225] : memref<32xi32, #tpu.memory_space<smem>>
      %c0_i32_147 = arith.constant 0 : i32
      %c0_i32_148 = arith.constant 0 : i32
      %c0_i32_149 = arith.constant 0 : i32
      %227 = tpu.memref_slice %arg3[%226, %c0_i32_149] : memref<64x128xf32, #tpu.memory_space<any>> -> memref<1x128xf32, #tpu.memory_space<any>>
      %c13_i32_150 = arith.constant 13 : i32
      %c0_i32_151 = arith.constant 0 : i32
      %228 = tpu.memref_slice %arg8[%c0_i32_147, %c13_i32_150, %c0_i32_151] : memref<2x16x128xf32, #tpu.memory_space<vmem>> -> memref<1x1x128xf32, #tpu.memory_space<vmem>>
      %229 = tpu.memref_squeeze %228 : memref<1x1x128xf32, #tpu.memory_space<vmem>> -> memref<1x128xf32, #tpu.memory_space<vmem>>
      %230 = tpu.memref_slice %arg9[%c0_i32_148] : memref<2x!tpu.dma_semaphore, #tpu.memory_space<semaphore_mem>> -> memref<1x!tpu.dma_semaphore, #tpu.memory_space<semaphore_mem>>
      %231 = tpu.memref_squeeze %230 : memref<1x!tpu.dma_semaphore, #tpu.memory_space<semaphore_mem>> -> memref<!tpu.dma_semaphore, #tpu.memory_space<semaphore_mem>>
      tpu.enqueue_dma source(%227 : memref<1x128xf32, #tpu.memory_space<any>>) target(%229 : memref<1x128xf32, #tpu.memory_space<vmem>>) target_semaphore(%231 : memref<!tpu.dma_semaphore, #tpu.memory_space<semaphore_mem>>)
      %c14_i32_152 = arith.constant 14 : i32
      %232 = arith.addi %119, %c14_i32_152 : i32
      %233 = arith.index_cast %232 : i32 to index
      %234 = memref.load %arg2[%233] : memref<32xi32, #tpu.memory_space<smem>>
      %c0_i32_153 = arith.constant 0 : i32
      %c0_i32_154 = arith.constant 0 : i32
      %c0_i32_155 = arith.constant 0 : i32
      %235 = tpu.memref_slice %arg3[%234, %c0_i32_155] : memref<64x128xf32, #tpu.memory_space<any>> -> memref<1x128xf32, #tpu.memory_space<any>>
      %c14_i32_156 = arith.constant 14 : i32
      %c0_i32_157 = arith.constant 0 : i32
      %236 = tpu.memref_slice %arg8[%c0_i32_153, %c14_i32_156, %c0_i32_157] : memref<2x16x128xf32, #tpu.memory_space<vmem>> -> memref<1x1x128xf32, #tpu.memory_space<vmem>>
      %237 = tpu.memref_squeeze %236 : memref<1x1x128xf32, #tpu.memory_space<vmem>> -> memref<1x128xf32, #tpu.memory_space<vmem>>
      %238 = tpu.memref_slice %arg9[%c0_i32_154] : memref<2x!tpu.dma_semaphore, #tpu.memory_space<semaphore_mem>> -> memref<1x!tpu.dma_semaphore, #tpu.memory_space<semaphore_mem>>
      %239 = tpu.memref_squeeze %238 : memref<1x!tpu.dma_semaphore, #tpu.memory_space<semaphore_mem>> -> memref<!tpu.dma_semaphore, #tpu.memory_space<semaphore_mem>>
      tpu.enqueue_dma source(%235 : memref<1x128xf32, #tpu.memory_space<any>>) target(%237 : memref<1x128xf32, #tpu.memory_space<vmem>>) target_semaphore(%239 : memref<!tpu.dma_semaphore, #tpu.memory_space<semaphore_mem>>)
      %c15_i32_158 = arith.constant 15 : i32
      %240 = arith.addi %119, %c15_i32_158 : i32
      %241 = arith.index_cast %240 : i32 to index
      %242 = memref.load %arg2[%241] : memref<32xi32, #tpu.memory_space<smem>>
      %c0_i32_159 = arith.constant 0 : i32
      %c0_i32_160 = arith.constant 0 : i32
      %c0_i32_161 = arith.constant 0 : i32
      %243 = tpu.memref_slice %arg3[%242, %c0_i32_161] : memref<64x128xf32, #tpu.memory_space<any>> -> memref<1x128xf32, #tpu.memory_space<any>>
      %c15_i32_162 = arith.constant 15 : i32
      %c0_i32_163 = arith.constant 0 : i32
      %244 = tpu.memref_slice %arg8[%c0_i32_159, %c15_i32_162, %c0_i32_163] : memref<2x16x128xf32, #tpu.memory_space<vmem>> -> memref<1x1x128xf32, #tpu.memory_space<vmem>>
      %245 = tpu.memref_squeeze %244 : memref<1x1x128xf32, #tpu.memory_space<vmem>> -> memref<1x128xf32, #tpu.memory_space<vmem>>
      %246 = tpu.memref_slice %arg9[%c0_i32_160] : memref<2x!tpu.dma_semaphore, #tpu.memory_space<semaphore_mem>> -> memref<1x!tpu.dma_semaphore, #tpu.memory_space<semaphore_mem>>
      %247 = tpu.memref_squeeze %246 : memref<1x!tpu.dma_semaphore, #tpu.memory_space<semaphore_mem>> -> memref<!tpu.dma_semaphore, #tpu.memory_space<semaphore_mem>>
      tpu.enqueue_dma source(%243 : memref<1x128xf32, #tpu.memory_space<any>>) target(%245 : memref<1x128xf32, #tpu.memory_space<vmem>>) target_semaphore(%247 : memref<!tpu.dma_semaphore, #tpu.memory_space<semaphore_mem>>)
    } else {
    }
    %c1_i32 = arith.constant 1 : i32
    %4 = arith.addi %arg1, %c1_i32 : i32
    %c1_i32_1 = arith.constant 1 : i32
    %5 = arith.cmpi slt, %4, %c1_i32_1 : i32
    %6 = arith.extui %5 : i1 to i32
    %c0_i32_2 = arith.constant 0 : i32
    %7 = arith.cmpi ne, %6, %c0_i32_2 : i32
    scf.if %7 {
      %c1_i32_67 = arith.constant 1 : i32
      %118 = arith.addi %arg1, %c1_i32_67 : i32
      %c1_i32_68 = arith.constant 1 : i32
      %119 = arith.subi %c1_i32_68, %0 : i32
      %c16_i32 = arith.constant 16 : i32
      %120 = arith.muli %arg0, %c16_i32 : i32
      %c16_i32_69 = arith.constant 16 : i32
      %121 = arith.muli %118, %c16_i32_69 : i32
      %122 = arith.addi %120, %121 : i32
      %c0_i32_70 = arith.constant 0 : i32
      %123 = arith.addi %122, %c0_i32_70 : i32
      %124 = arith.index_cast %123 : i32 to index
      %125 = memref.load %arg2[%124] : memref<32xi32, #tpu.memory_space<smem>>
      %c0_i32_71 = arith.constant 0 : i32
      %126 = tpu.memref_slice %arg3[%125, %c0_i32_71] : memref<64x128xf32, #tpu.memory_space<any>> -> memref<1x128xf32, #tpu.memory_space<any>>
      %c0_i32_72 = arith.constant 0 : i32
      %c0_i32_73 = arith.constant 0 : i32
      %127 = tpu.memref_slice %arg8[%119, %c0_i32_72, %c0_i32_73] : memref<2x16x128xf32, #tpu.memory_space<vmem>> -> memref<1x1x128xf32, #tpu.memory_space<vmem>>
      %128 = tpu.memref_squeeze %127 : memref<1x1x128xf32, #tpu.memory_space<vmem>> -> memref<1x128xf32, #tpu.memory_space<vmem>>
      %129 = tpu.memref_slice %arg9[%119] : memref<2x!tpu.dma_semaphore, #tpu.memory_space<semaphore_mem>> -> memref<1x!tpu.dma_semaphore, #tpu.memory_space<semaphore_mem>>
      %130 = tpu.memref_squeeze %129 : memref<1x!tpu.dma_semaphore, #tpu.memory_space<semaphore_mem>> -> memref<!tpu.dma_semaphore, #tpu.memory_space<semaphore_mem>>
      tpu.enqueue_dma source(%126 : memref<1x128xf32, #tpu.memory_space<any>>) target(%128 : memref<1x128xf32, #tpu.memory_space<vmem>>) target_semaphore(%130 : memref<!tpu.dma_semaphore, #tpu.memory_space<semaphore_mem>>)
      %c1_i32_74 = arith.constant 1 : i32
      %131 = arith.addi %122, %c1_i32_74 : i32
      %132 = arith.index_cast %131 : i32 to index
      %133 = memref.load %arg2[%132] : memref<32xi32, #tpu.memory_space<smem>>
      %c0_i32_75 = arith.constant 0 : i32
      %134 = tpu.memref_slice %arg3[%133, %c0_i32_75] : memref<64x128xf32, #tpu.memory_space<any>> -> memref<1x128xf32, #tpu.memory_space<any>>
      %c1_i32_76 = arith.constant 1 : i32
      %c0_i32_77 = arith.constant 0 : i32
      %135 = tpu.memref_slice %arg8[%119, %c1_i32_76, %c0_i32_77] : memref<2x16x128xf32, #tpu.memory_space<vmem>> -> memref<1x1x128xf32, #tpu.memory_space<vmem>>
      %136 = tpu.memref_squeeze %135 : memref<1x1x128xf32, #tpu.memory_space<vmem>> -> memref<1x128xf32, #tpu.memory_space<vmem>>
      %137 = tpu.memref_slice %arg9[%119] : memref<2x!tpu.dma_semaphore, #tpu.memory_space<semaphore_mem>> -> memref<1x!tpu.dma_semaphore, #tpu.memory_space<semaphore_mem>>
      %138 = tpu.memref_squeeze %137 : memref<1x!tpu.dma_semaphore, #tpu.memory_space<semaphore_mem>> -> memref<!tpu.dma_semaphore, #tpu.memory_space<semaphore_mem>>
      tpu.enqueue_dma source(%134 : memref<1x128xf32, #tpu.memory_space<any>>) target(%136 : memref<1x128xf32, #tpu.memory_space<vmem>>) target_semaphore(%138 : memref<!tpu.dma_semaphore, #tpu.memory_space<semaphore_mem>>)
      %c2_i32_78 = arith.constant 2 : i32
      %139 = arith.addi %122, %c2_i32_78 : i32
      %140 = arith.index_cast %139 : i32 to index
      %141 = memref.load %arg2[%140] : memref<32xi32, #tpu.memory_space<smem>>
      %c0_i32_79 = arith.constant 0 : i32
      %142 = tpu.memref_slice %arg3[%141, %c0_i32_79] : memref<64x128xf32, #tpu.memory_space<any>> -> memref<1x128xf32, #tpu.memory_space<any>>
      %c2_i32_80 = arith.constant 2 : i32
      %c0_i32_81 = arith.constant 0 : i32
      %143 = tpu.memref_slice %arg8[%119, %c2_i32_80, %c0_i32_81] : memref<2x16x128xf32, #tpu.memory_space<vmem>> -> memref<1x1x128xf32, #tpu.memory_space<vmem>>
      %144 = tpu.memref_squeeze %143 : memref<1x1x128xf32, #tpu.memory_space<vmem>> -> memref<1x128xf32, #tpu.memory_space<vmem>>
      %145 = tpu.memref_slice %arg9[%119] : memref<2x!tpu.dma_semaphore, #tpu.memory_space<semaphore_mem>> -> memref<1x!tpu.dma_semaphore, #tpu.memory_space<semaphore_mem>>
      %146 = tpu.memref_squeeze %145 : memref<1x!tpu.dma_semaphore, #tpu.memory_space<semaphore_mem>> -> memref<!tpu.dma_semaphore, #tpu.memory_space<semaphore_mem>>
      tpu.enqueue_dma source(%142 : memref<1x128xf32, #tpu.memory_space<any>>) target(%144 : memref<1x128xf32, #tpu.memory_space<vmem>>) target_semaphore(%146 : memref<!tpu.dma_semaphore, #tpu.memory_space<semaphore_mem>>)
      %c3_i32_82 = arith.constant 3 : i32
      %147 = arith.addi %122, %c3_i32_82 : i32
      %148 = arith.index_cast %147 : i32 to index
      %149 = memref.load %arg2[%148] : memref<32xi32, #tpu.memory_space<smem>>
      %c0_i32_83 = arith.constant 0 : i32
      %150 = tpu.memref_slice %arg3[%149, %c0_i32_83] : memref<64x128xf32, #tpu.memory_space<any>> -> memref<1x128xf32, #tpu.memory_space<any>>
      %c3_i32_84 = arith.constant 3 : i32
      %c0_i32_85 = arith.constant 0 : i32
      %151 = tpu.memref_slice %arg8[%119, %c3_i32_84, %c0_i32_85] : memref<2x16x128xf32, #tpu.memory_space<vmem>> -> memref<1x1x128xf32, #tpu.memory_space<vmem>>
      %152 = tpu.memref_squeeze %151 : memref<1x1x128xf32, #tpu.memory_space<vmem>> -> memref<1x128xf32, #tpu.memory_space<vmem>>
      %153 = tpu.memref_slice %arg9[%119] : memref<2x!tpu.dma_semaphore, #tpu.memory_space<semaphore_mem>> -> memref<1x!tpu.dma_semaphore, #tpu.memory_space<semaphore_mem>>
      %154 = tpu.memref_squeeze %153 : memref<1x!tpu.dma_semaphore, #tpu.memory_space<semaphore_mem>> -> memref<!tpu.dma_semaphore, #tpu.memory_space<semaphore_mem>>
      tpu.enqueue_dma source(%150 : memref<1x128xf32, #tpu.memory_space<any>>) target(%152 : memref<1x128xf32, #tpu.memory_space<vmem>>) target_semaphore(%154 : memref<!tpu.dma_semaphore, #tpu.memory_space<semaphore_mem>>)
      %c4_i32_86 = arith.constant 4 : i32
      %155 = arith.addi %122, %c4_i32_86 : i32
      %156 = arith.index_cast %155 : i32 to index
      %157 = memref.load %arg2[%156] : memref<32xi32, #tpu.memory_space<smem>>
      %c0_i32_87 = arith.constant 0 : i32
      %158 = tpu.memref_slice %arg3[%157, %c0_i32_87] : memref<64x128xf32, #tpu.memory_space<any>> -> memref<1x128xf32, #tpu.memory_space<any>>
      %c4_i32_88 = arith.constant 4 : i32
      %c0_i32_89 = arith.constant 0 : i32
      %159 = tpu.memref_slice %arg8[%119, %c4_i32_88, %c0_i32_89] : memref<2x16x128xf32, #tpu.memory_space<vmem>> -> memref<1x1x128xf32, #tpu.memory_space<vmem>>
      %160 = tpu.memref_squeeze %159 : memref<1x1x128xf32, #tpu.memory_space<vmem>> -> memref<1x128xf32, #tpu.memory_space<vmem>>
      %161 = tpu.memref_slice %arg9[%119] : memref<2x!tpu.dma_semaphore, #tpu.memory_space<semaphore_mem>> -> memref<1x!tpu.dma_semaphore, #tpu.memory_space<semaphore_mem>>
      %162 = tpu.memref_squeeze %161 : memref<1x!tpu.dma_semaphore, #tpu.memory_space<semaphore_mem>> -> memref<!tpu.dma_semaphore, #tpu.memory_space<semaphore_mem>>
      tpu.enqueue_dma source(%158 : memref<1x128xf32, #tpu.memory_space<any>>) target(%160 : memref<1x128xf32, #tpu.memory_space<vmem>>) target_semaphore(%162 : memref<!tpu.dma_semaphore, #tpu.memory_space<semaphore_mem>>)
      %c5_i32_90 = arith.constant 5 : i32
      %163 = arith.addi %122, %c5_i32_90 : i32
      %164 = arith.index_cast %163 : i32 to index
      %165 = memref.load %arg2[%164] : memref<32xi32, #tpu.memory_space<smem>>
      %c0_i32_91 = arith.constant 0 : i32
      %166 = tpu.memref_slice %arg3[%165, %c0_i32_91] : memref<64x128xf32, #tpu.memory_space<any>> -> memref<1x128xf32, #tpu.memory_space<any>>
      %c5_i32_92 = arith.constant 5 : i32
      %c0_i32_93 = arith.constant 0 : i32
      %167 = tpu.memref_slice %arg8[%119, %c5_i32_92, %c0_i32_93] : memref<2x16x128xf32, #tpu.memory_space<vmem>> -> memref<1x1x128xf32, #tpu.memory_space<vmem>>
      %168 = tpu.memref_squeeze %167 : memref<1x1x128xf32, #tpu.memory_space<vmem>> -> memref<1x128xf32, #tpu.memory_space<vmem>>
      %169 = tpu.memref_slice %arg9[%119] : memref<2x!tpu.dma_semaphore, #tpu.memory_space<semaphore_mem>> -> memref<1x!tpu.dma_semaphore, #tpu.memory_space<semaphore_mem>>
      %170 = tpu.memref_squeeze %169 : memref<1x!tpu.dma_semaphore, #tpu.memory_space<semaphore_mem>> -> memref<!tpu.dma_semaphore, #tpu.memory_space<semaphore_mem>>
      tpu.enqueue_dma source(%166 : memref<1x128xf32, #tpu.memory_space<any>>) target(%168 : memref<1x128xf32, #tpu.memory_space<vmem>>) target_semaphore(%170 : memref<!tpu.dma_semaphore, #tpu.memory_space<semaphore_mem>>)
      %c6_i32_94 = arith.constant 6 : i32
      %171 = arith.addi %122, %c6_i32_94 : i32
      %172 = arith.index_cast %171 : i32 to index
      %173 = memref.load %arg2[%172] : memref<32xi32, #tpu.memory_space<smem>>
      %c0_i32_95 = arith.constant 0 : i32
      %174 = tpu.memref_slice %arg3[%173, %c0_i32_95] : memref<64x128xf32, #tpu.memory_space<any>> -> memref<1x128xf32, #tpu.memory_space<any>>
      %c6_i32_96 = arith.constant 6 : i32
      %c0_i32_97 = arith.constant 0 : i32
      %175 = tpu.memref_slice %arg8[%119, %c6_i32_96, %c0_i32_97] : memref<2x16x128xf32, #tpu.memory_space<vmem>> -> memref<1x1x128xf32, #tpu.memory_space<vmem>>
      %176 = tpu.memref_squeeze %175 : memref<1x1x128xf32, #tpu.memory_space<vmem>> -> memref<1x128xf32, #tpu.memory_space<vmem>>
      %177 = tpu.memref_slice %arg9[%119] : memref<2x!tpu.dma_semaphore, #tpu.memory_space<semaphore_mem>> -> memref<1x!tpu.dma_semaphore, #tpu.memory_space<semaphore_mem>>
      %178 = tpu.memref_squeeze %177 : memref<1x!tpu.dma_semaphore, #tpu.memory_space<semaphore_mem>> -> memref<!tpu.dma_semaphore, #tpu.memory_space<semaphore_mem>>
      tpu.enqueue_dma source(%174 : memref<1x128xf32, #tpu.memory_space<any>>) target(%176 : memref<1x128xf32, #tpu.memory_space<vmem>>) target_semaphore(%178 : memref<!tpu.dma_semaphore, #tpu.memory_space<semaphore_mem>>)
      %c7_i32_98 = arith.constant 7 : i32
      %179 = arith.addi %122, %c7_i32_98 : i32
      %180 = arith.index_cast %179 : i32 to index
      %181 = memref.load %arg2[%180] : memref<32xi32, #tpu.memory_space<smem>>
      %c0_i32_99 = arith.constant 0 : i32
      %182 = tpu.memref_slice %arg3[%181, %c0_i32_99] : memref<64x128xf32, #tpu.memory_space<any>> -> memref<1x128xf32, #tpu.memory_space<any>>
      %c7_i32_100 = arith.constant 7 : i32
      %c0_i32_101 = arith.constant 0 : i32
      %183 = tpu.memref_slice %arg8[%119, %c7_i32_100, %c0_i32_101] : memref<2x16x128xf32, #tpu.memory_space<vmem>> -> memref<1x1x128xf32, #tpu.memory_space<vmem>>
      %184 = tpu.memref_squeeze %183 : memref<1x1x128xf32, #tpu.memory_space<vmem>> -> memref<1x128xf32, #tpu.memory_space<vmem>>
      %185 = tpu.memref_slice %arg9[%119] : memref<2x!tpu.dma_semaphore, #tpu.memory_space<semaphore_mem>> -> memref<1x!tpu.dma_semaphore, #tpu.memory_space<semaphore_mem>>
      %186 = tpu.memref_squeeze %185 : memref<1x!tpu.dma_semaphore, #tpu.memory_space<semaphore_mem>> -> memref<!tpu.dma_semaphore, #tpu.memory_space<semaphore_mem>>
      tpu.enqueue_dma source(%182 : memref<1x128xf32, #tpu.memory_space<any>>) target(%184 : memref<1x128xf32, #tpu.memory_space<vmem>>) target_semaphore(%186 : memref<!tpu.dma_semaphore, #tpu.memory_space<semaphore_mem>>)
      %c8_i32_102 = arith.constant 8 : i32
      %187 = arith.addi %122, %c8_i32_102 : i32
      %188 = arith.index_cast %187 : i32 to index
      %189 = memref.load %arg2[%188] : memref<32xi32, #tpu.memory_space<smem>>
      %c0_i32_103 = arith.constant 0 : i32
      %190 = tpu.memref_slice %arg3[%189, %c0_i32_103] : memref<64x128xf32, #tpu.memory_space<any>> -> memref<1x128xf32, #tpu.memory_space<any>>
      %c8_i32_104 = arith.constant 8 : i32
      %c0_i32_105 = arith.constant 0 : i32
      %191 = tpu.memref_slice %arg8[%119, %c8_i32_104, %c0_i32_105] : memref<2x16x128xf32, #tpu.memory_space<vmem>> -> memref<1x1x128xf32, #tpu.memory_space<vmem>>
      %192 = tpu.memref_squeeze %191 : memref<1x1x128xf32, #tpu.memory_space<vmem>> -> memref<1x128xf32, #tpu.memory_space<vmem>>
      %193 = tpu.memref_slice %arg9[%119] : memref<2x!tpu.dma_semaphore, #tpu.memory_space<semaphore_mem>> -> memref<1x!tpu.dma_semaphore, #tpu.memory_space<semaphore_mem>>
      %194 = tpu.memref_squeeze %193 : memref<1x!tpu.dma_semaphore, #tpu.memory_space<semaphore_mem>> -> memref<!tpu.dma_semaphore, #tpu.memory_space<semaphore_mem>>
      tpu.enqueue_dma source(%190 : memref<1x128xf32, #tpu.memory_space<any>>) target(%192 : memref<1x128xf32, #tpu.memory_space<vmem>>) target_semaphore(%194 : memref<!tpu.dma_semaphore, #tpu.memory_space<semaphore_mem>>)
      %c9_i32_106 = arith.constant 9 : i32
      %195 = arith.addi %122, %c9_i32_106 : i32
      %196 = arith.index_cast %195 : i32 to index
      %197 = memref.load %arg2[%196] : memref<32xi32, #tpu.memory_space<smem>>
      %c0_i32_107 = arith.constant 0 : i32
      %198 = tpu.memref_slice %arg3[%197, %c0_i32_107] : memref<64x128xf32, #tpu.memory_space<any>> -> memref<1x128xf32, #tpu.memory_space<any>>
      %c9_i32_108 = arith.constant 9 : i32
      %c0_i32_109 = arith.constant 0 : i32
      %199 = tpu.memref_slice %arg8[%119, %c9_i32_108, %c0_i32_109] : memref<2x16x128xf32, #tpu.memory_space<vmem>> -> memref<1x1x128xf32, #tpu.memory_space<vmem>>
      %200 = tpu.memref_squeeze %199 : memref<1x1x128xf32, #tpu.memory_space<vmem>> -> memref<1x128xf32, #tpu.memory_space<vmem>>
      %201 = tpu.memref_slice %arg9[%119] : memref<2x!tpu.dma_semaphore, #tpu.memory_space<semaphore_mem>> -> memref<1x!tpu.dma_semaphore, #tpu.memory_space<semaphore_mem>>
      %202 = tpu.memref_squeeze %201 : memref<1x!tpu.dma_semaphore, #tpu.memory_space<semaphore_mem>> -> memref<!tpu.dma_semaphore, #tpu.memory_space<semaphore_mem>>
      tpu.enqueue_dma source(%198 : memref<1x128xf32, #tpu.memory_space<any>>) target(%200 : memref<1x128xf32, #tpu.memory_space<vmem>>) target_semaphore(%202 : memref<!tpu.dma_semaphore, #tpu.memory_space<semaphore_mem>>)
      %c10_i32_110 = arith.constant 10 : i32
      %203 = arith.addi %122, %c10_i32_110 : i32
      %204 = arith.index_cast %203 : i32 to index
      %205 = memref.load %arg2[%204] : memref<32xi32, #tpu.memory_space<smem>>
      %c0_i32_111 = arith.constant 0 : i32
      %206 = tpu.memref_slice %arg3[%205, %c0_i32_111] : memref<64x128xf32, #tpu.memory_space<any>> -> memref<1x128xf32, #tpu.memory_space<any>>
      %c10_i32_112 = arith.constant 10 : i32
      %c0_i32_113 = arith.constant 0 : i32
      %207 = tpu.memref_slice %arg8[%119, %c10_i32_112, %c0_i32_113] : memref<2x16x128xf32, #tpu.memory_space<vmem>> -> memref<1x1x128xf32, #tpu.memory_space<vmem>>
      %208 = tpu.memref_squeeze %207 : memref<1x1x128xf32, #tpu.memory_space<vmem>> -> memref<1x128xf32, #tpu.memory_space<vmem>>
      %209 = tpu.memref_slice %arg9[%119] : memref<2x!tpu.dma_semaphore, #tpu.memory_space<semaphore_mem>> -> memref<1x!tpu.dma_semaphore, #tpu.memory_space<semaphore_mem>>
      %210 = tpu.memref_squeeze %209 : memref<1x!tpu.dma_semaphore, #tpu.memory_space<semaphore_mem>> -> memref<!tpu.dma_semaphore, #tpu.memory_space<semaphore_mem>>
      tpu.enqueue_dma source(%206 : memref<1x128xf32, #tpu.memory_space<any>>) target(%208 : memref<1x128xf32, #tpu.memory_space<vmem>>) target_semaphore(%210 : memref<!tpu.dma_semaphore, #tpu.memory_space<semaphore_mem>>)
      %c11_i32_114 = arith.constant 11 : i32
      %211 = arith.addi %122, %c11_i32_114 : i32
      %212 = arith.index_cast %211 : i32 to index
      %213 = memref.load %arg2[%212] : memref<32xi32, #tpu.memory_space<smem>>
      %c0_i32_115 = arith.constant 0 : i32
      %214 = tpu.memref_slice %arg3[%213, %c0_i32_115] : memref<64x128xf32, #tpu.memory_space<any>> -> memref<1x128xf32, #tpu.memory_space<any>>
      %c11_i32_116 = arith.constant 11 : i32
      %c0_i32_117 = arith.constant 0 : i32
      %215 = tpu.memref_slice %arg8[%119, %c11_i32_116, %c0_i32_117] : memref<2x16x128xf32, #tpu.memory_space<vmem>> -> memref<1x1x128xf32, #tpu.memory_space<vmem>>
      %216 = tpu.memref_squeeze %215 : memref<1x1x128xf32, #tpu.memory_space<vmem>> -> memref<1x128xf32, #tpu.memory_space<vmem>>
      %217 = tpu.memref_slice %arg9[%119] : memref<2x!tpu.dma_semaphore, #tpu.memory_space<semaphore_mem>> -> memref<1x!tpu.dma_semaphore, #tpu.memory_space<semaphore_mem>>
      %218 = tpu.memref_squeeze %217 : memref<1x!tpu.dma_semaphore, #tpu.memory_space<semaphore_mem>> -> memref<!tpu.dma_semaphore, #tpu.memory_space<semaphore_mem>>
      tpu.enqueue_dma source(%214 : memref<1x128xf32, #tpu.memory_space<any>>) target(%216 : memref<1x128xf32, #tpu.memory_space<vmem>>) target_semaphore(%218 : memref<!tpu.dma_semaphore, #tpu.memory_space<semaphore_mem>>)
      %c12_i32_118 = arith.constant 12 : i32
      %219 = arith.addi %122, %c12_i32_118 : i32
      %220 = arith.index_cast %219 : i32 to index
      %221 = memref.load %arg2[%220] : memref<32xi32, #tpu.memory_space<smem>>
      %c0_i32_119 = arith.constant 0 : i32
      %222 = tpu.memref_slice %arg3[%221, %c0_i32_119] : memref<64x128xf32, #tpu.memory_space<any>> -> memref<1x128xf32, #tpu.memory_space<any>>
      %c12_i32_120 = arith.constant 12 : i32
      %c0_i32_121 = arith.constant 0 : i32
      %223 = tpu.memref_slice %arg8[%119, %c12_i32_120, %c0_i32_121] : memref<2x16x128xf32, #tpu.memory_space<vmem>> -> memref<1x1x128xf32, #tpu.memory_space<vmem>>
      %224 = tpu.memref_squeeze %223 : memref<1x1x128xf32, #tpu.memory_space<vmem>> -> memref<1x128xf32, #tpu.memory_space<vmem>>
      %225 = tpu.memref_slice %arg9[%119] : memref<2x!tpu.dma_semaphore, #tpu.memory_space<semaphore_mem>> -> memref<1x!tpu.dma_semaphore, #tpu.memory_space<semaphore_mem>>
      %226 = tpu.memref_squeeze %225 : memref<1x!tpu.dma_semaphore, #tpu.memory_space<semaphore_mem>> -> memref<!tpu.dma_semaphore, #tpu.memory_space<semaphore_mem>>
      tpu.enqueue_dma source(%222 : memref<1x128xf32, #tpu.memory_space<any>>) target(%224 : memref<1x128xf32, #tpu.memory_space<vmem>>) target_semaphore(%226 : memref<!tpu.dma_semaphore, #tpu.memory_space<semaphore_mem>>)
      %c13_i32_122 = arith.constant 13 : i32
      %227 = arith.addi %122, %c13_i32_122 : i32
      %228 = arith.index_cast %227 : i32 to index
      %229 = memref.load %arg2[%228] : memref<32xi32, #tpu.memory_space<smem>>
      %c0_i32_123 = arith.constant 0 : i32
      %230 = tpu.memref_slice %arg3[%229, %c0_i32_123] : memref<64x128xf32, #tpu.memory_space<any>> -> memref<1x128xf32, #tpu.memory_space<any>>
      %c13_i32_124 = arith.constant 13 : i32
      %c0_i32_125 = arith.constant 0 : i32
      %231 = tpu.memref_slice %arg8[%119, %c13_i32_124, %c0_i32_125] : memref<2x16x128xf32, #tpu.memory_space<vmem>> -> memref<1x1x128xf32, #tpu.memory_space<vmem>>
      %232 = tpu.memref_squeeze %231 : memref<1x1x128xf32, #tpu.memory_space<vmem>> -> memref<1x128xf32, #tpu.memory_space<vmem>>
      %233 = tpu.memref_slice %arg9[%119] : memref<2x!tpu.dma_semaphore, #tpu.memory_space<semaphore_mem>> -> memref<1x!tpu.dma_semaphore, #tpu.memory_space<semaphore_mem>>
      %234 = tpu.memref_squeeze %233 : memref<1x!tpu.dma_semaphore, #tpu.memory_space<semaphore_mem>> -> memref<!tpu.dma_semaphore, #tpu.memory_space<semaphore_mem>>
      tpu.enqueue_dma source(%230 : memref<1x128xf32, #tpu.memory_space<any>>) target(%232 : memref<1x128xf32, #tpu.memory_space<vmem>>) target_semaphore(%234 : memref<!tpu.dma_semaphore, #tpu.memory_space<semaphore_mem>>)
      %c14_i32_126 = arith.constant 14 : i32
      %235 = arith.addi %122, %c14_i32_126 : i32
      %236 = arith.index_cast %235 : i32 to index
      %237 = memref.load %arg2[%236] : memref<32xi32, #tpu.memory_space<smem>>
      %c0_i32_127 = arith.constant 0 : i32
      %238 = tpu.memref_slice %arg3[%237, %c0_i32_127] : memref<64x128xf32, #tpu.memory_space<any>> -> memref<1x128xf32, #tpu.memory_space<any>>
      %c14_i32_128 = arith.constant 14 : i32
      %c0_i32_129 = arith.constant 0 : i32
      %239 = tpu.memref_slice %arg8[%119, %c14_i32_128, %c0_i32_129] : memref<2x16x128xf32, #tpu.memory_space<vmem>> -> memref<1x1x128xf32, #tpu.memory_space<vmem>>
      %240 = tpu.memref_squeeze %239 : memref<1x1x128xf32, #tpu.memory_space<vmem>> -> memref<1x128xf32, #tpu.memory_space<vmem>>
      %241 = tpu.memref_slice %arg9[%119] : memref<2x!tpu.dma_semaphore, #tpu.memory_space<semaphore_mem>> -> memref<1x!tpu.dma_semaphore, #tpu.memory_space<semaphore_mem>>
      %242 = tpu.memref_squeeze %241 : memref<1x!tpu.dma_semaphore, #tpu.memory_space<semaphore_mem>> -> memref<!tpu.dma_semaphore, #tpu.memory_space<semaphore_mem>>
      tpu.enqueue_dma source(%238 : memref<1x128xf32, #tpu.memory_space<any>>) target(%240 : memref<1x128xf32, #tpu.memory_space<vmem>>) target_semaphore(%242 : memref<!tpu.dma_semaphore, #tpu.memory_space<semaphore_mem>>)
      %c15_i32_130 = arith.constant 15 : i32
      %243 = arith.addi %122, %c15_i32_130 : i32
      %244 = arith.index_cast %243 : i32 to index
      %245 = memref.load %arg2[%244] : memref<32xi32, #tpu.memory_space<smem>>
      %c0_i32_131 = arith.constant 0 : i32
      %246 = tpu.memref_slice %arg3[%245, %c0_i32_131] : memref<64x128xf32, #tpu.memory_space<any>> -> memref<1x128xf32, #tpu.memory_space<any>>
      %c15_i32_132 = arith.constant 15 : i32
      %c0_i32_133 = arith.constant 0 : i32
      %247 = tpu.memref_slice %arg8[%119, %c15_i32_132, %c0_i32_133] : memref<2x16x128xf32, #tpu.memory_space<vmem>> -> memref<1x1x128xf32, #tpu.memory_space<vmem>>
      %248 = tpu.memref_squeeze %247 : memref<1x1x128xf32, #tpu.memory_space<vmem>> -> memref<1x128xf32, #tpu.memory_space<vmem>>
      %249 = tpu.memref_slice %arg9[%119] : memref<2x!tpu.dma_semaphore, #tpu.memory_space<semaphore_mem>> -> memref<1x!tpu.dma_semaphore, #tpu.memory_space<semaphore_mem>>
      %250 = tpu.memref_squeeze %249 : memref<1x!tpu.dma_semaphore, #tpu.memory_space<semaphore_mem>> -> memref<!tpu.dma_semaphore, #tpu.memory_space<semaphore_mem>>
      tpu.enqueue_dma source(%246 : memref<1x128xf32, #tpu.memory_space<any>>) target(%248 : memref<1x128xf32, #tpu.memory_space<vmem>>) target_semaphore(%250 : memref<!tpu.dma_semaphore, #tpu.memory_space<semaphore_mem>>)
    } else {
    }
    %c0_i32_3 = arith.constant 0 : i32
    %c0_i32_4 = arith.constant 0 : i32
    %8 = tpu.memref_slice %arg3[%c0_i32_3, %c0_i32_4] : memref<64x128xf32, #tpu.memory_space<any>> -> memref<1x128xf32, #tpu.memory_space<any>>
    %c0_i32_5 = arith.constant 0 : i32
    %c0_i32_6 = arith.constant 0 : i32
    %9 = tpu.memref_slice %arg8[%0, %c0_i32_5, %c0_i32_6] : memref<2x16x128xf32, #tpu.memory_space<vmem>> -> memref<1x1x128xf32, #tpu.memory_space<vmem>>
    %10 = tpu.memref_squeeze %9 : memref<1x1x128xf32, #tpu.memory_space<vmem>> -> memref<1x128xf32, #tpu.memory_space<vmem>>
    %11 = tpu.memref_slice %arg9[%0] : memref<2x!tpu.dma_semaphore, #tpu.memory_space<semaphore_mem>> -> memref<1x!tpu.dma_semaphore, #tpu.memory_space<semaphore_mem>>
    %12 = tpu.memref_squeeze %11 : memref<1x!tpu.dma_semaphore, #tpu.memory_space<semaphore_mem>> -> memref<!tpu.dma_semaphore, #tpu.memory_space<semaphore_mem>>
    tpu.wait_dma2 semaphore(%12 : memref<!tpu.dma_semaphore, #tpu.memory_space<semaphore_mem>>) src(%8 : memref<1x128xf32, #tpu.memory_space<any>>) dst(%10 : memref<1x128xf32, #tpu.memory_space<vmem>>)
    %c0_i32_7 = arith.constant 0 : i32
    %c0_i32_8 = arith.constant 0 : i32
    %13 = tpu.memref_slice %arg3[%c0_i32_7, %c0_i32_8] : memref<64x128xf32, #tpu.memory_space<any>> -> memref<1x128xf32, #tpu.memory_space<any>>
    %c1_i32_9 = arith.constant 1 : i32
    %c0_i32_10 = arith.constant 0 : i32
    %14 = tpu.memref_slice %arg8[%0, %c1_i32_9, %c0_i32_10] : memref<2x16x128xf32, #tpu.memory_space<vmem>> -> memref<1x1x128xf32, #tpu.memory_space<vmem>>
    %15 = tpu.memref_squeeze %14 : memref<1x1x128xf32, #tpu.memory_space<vmem>> -> memref<1x128xf32, #tpu.memory_space<vmem>>
    %16 = tpu.memref_slice %arg9[%0] : memref<2x!tpu.dma_semaphore, #tpu.memory_space<semaphore_mem>> -> memref<1x!tpu.dma_semaphore, #tpu.memory_space<semaphore_mem>>
    %17 = tpu.memref_squeeze %16 : memref<1x!tpu.dma_semaphore, #tpu.memory_space<semaphore_mem>> -> memref<!tpu.dma_semaphore, #tpu.memory_space<semaphore_mem>>
    tpu.wait_dma2 semaphore(%17 : memref<!tpu.dma_semaphore, #tpu.memory_space<semaphore_mem>>) src(%13 : memref<1x128xf32, #tpu.memory_space<any>>) dst(%15 : memref<1x128xf32, #tpu.memory_space<vmem>>)
    %c0_i32_11 = arith.constant 0 : i32
    %c0_i32_12 = arith.constant 0 : i32
    %18 = tpu.memref_slice %arg3[%c0_i32_11, %c0_i32_12] : memref<64x128xf32, #tpu.memory_space<any>> -> memref<1x128xf32, #tpu.memory_space<any>>
    %c2_i32_13 = arith.constant 2 : i32
    %c0_i32_14 = arith.constant 0 : i32
    %19 = tpu.memref_slice %arg8[%0, %c2_i32_13, %c0_i32_14] : memref<2x16x128xf32, #tpu.memory_space<vmem>> -> memref<1x1x128xf32, #tpu.memory_space<vmem>>
    %20 = tpu.memref_squeeze %19 : memref<1x1x128xf32, #tpu.memory_space<vmem>> -> memref<1x128xf32, #tpu.memory_space<vmem>>
    %21 = tpu.memref_slice %arg9[%0] : memref<2x!tpu.dma_semaphore, #tpu.memory_space<semaphore_mem>> -> memref<1x!tpu.dma_semaphore, #tpu.memory_space<semaphore_mem>>
    %22 = tpu.memref_squeeze %21 : memref<1x!tpu.dma_semaphore, #tpu.memory_space<semaphore_mem>> -> memref<!tpu.dma_semaphore, #tpu.memory_space<semaphore_mem>>
    tpu.wait_dma2 semaphore(%22 : memref<!tpu.dma_semaphore, #tpu.memory_space<semaphore_mem>>) src(%18 : memref<1x128xf32, #tpu.memory_space<any>>) dst(%20 : memref<1x128xf32, #tpu.memory_space<vmem>>)
    %c0_i32_15 = arith.constant 0 : i32
    %c0_i32_16 = arith.constant 0 : i32
    %23 = tpu.memref_slice %arg3[%c0_i32_15, %c0_i32_16] : memref<64x128xf32, #tpu.memory_space<any>> -> memref<1x128xf32, #tpu.memory_space<any>>
    %c3_i32 = arith.constant 3 : i32
    %c0_i32_17 = arith.constant 0 : i32
    %24 = tpu.memref_slice %arg8[%0, %c3_i32, %c0_i32_17] : memref<2x16x128xf32, #tpu.memory_space<vmem>> -> memref<1x1x128xf32, #tpu.memory_space<vmem>>
    %25 = tpu.memref_squeeze %24 : memref<1x1x128xf32, #tpu.memory_space<vmem>> -> memref<1x128xf32, #tpu.memory_space<vmem>>
    %26 = tpu.memref_slice %arg9[%0] : memref<2x!tpu.dma_semaphore, #tpu.memory_space<semaphore_mem>> -> memref<1x!tpu.dma_semaphore, #tpu.memory_space<semaphore_mem>>
    %27 = tpu.memref_squeeze %26 : memref<1x!tpu.dma_semaphore, #tpu.memory_space<semaphore_mem>> -> memref<!tpu.dma_semaphore, #tpu.memory_space<semaphore_mem>>
    tpu.wait_dma2 semaphore(%27 : memref<!tpu.dma_semaphore, #tpu.memory_space<semaphore_mem>>) src(%23 : memref<1x128xf32, #tpu.memory_space<any>>) dst(%25 : memref<1x128xf32, #tpu.memory_space<vmem>>)
    %c0_i32_18 = arith.constant 0 : i32
    %c0_i32_19 = arith.constant 0 : i32
    %28 = tpu.memref_slice %arg3[%c0_i32_18, %c0_i32_19] : memref<64x128xf32, #tpu.memory_space<any>> -> memref<1x128xf32, #tpu.memory_space<any>>
    %c4_i32 = arith.constant 4 : i32
    %c0_i32_20 = arith.constant 0 : i32
    %29 = tpu.memref_slice %arg8[%0, %c4_i32, %c0_i32_20] : memref<2x16x128xf32, #tpu.memory_space<vmem>> -> memref<1x1x128xf32, #tpu.memory_space<vmem>>
    %30 = tpu.memref_squeeze %29 : memref<1x1x128xf32, #tpu.memory_space<vmem>> -> memref<1x128xf32, #tpu.memory_space<vmem>>
    %31 = tpu.memref_slice %arg9[%0] : memref<2x!tpu.dma_semaphore, #tpu.memory_space<semaphore_mem>> -> memref<1x!tpu.dma_semaphore, #tpu.memory_space<semaphore_mem>>
    %32 = tpu.memref_squeeze %31 : memref<1x!tpu.dma_semaphore, #tpu.memory_space<semaphore_mem>> -> memref<!tpu.dma_semaphore, #tpu.memory_space<semaphore_mem>>
    tpu.wait_dma2 semaphore(%32 : memref<!tpu.dma_semaphore, #tpu.memory_space<semaphore_mem>>) src(%28 : memref<1x128xf32, #tpu.memory_space<any>>) dst(%30 : memref<1x128xf32, #tpu.memory_space<vmem>>)
    %c0_i32_21 = arith.constant 0 : i32
    %c0_i32_22 = arith.constant 0 : i32
    %33 = tpu.memref_slice %arg3[%c0_i32_21, %c0_i32_22] : memref<64x128xf32, #tpu.memory_space<any>> -> memref<1x128xf32, #tpu.memory_space<any>>
    %c5_i32 = arith.constant 5 : i32
    %c0_i32_23 = arith.constant 0 : i32
    %34 = tpu.memref_slice %arg8[%0, %c5_i32, %c0_i32_23] : memref<2x16x128xf32, #tpu.memory_space<vmem>> -> memref<1x1x128xf32, #tpu.memory_space<vmem>>
    %35 = tpu.memref_squeeze %34 : memref<1x1x128xf32, #tpu.memory_space<vmem>> -> memref<1x128xf32, #tpu.memory_space<vmem>>
    %36 = tpu.memref_slice %arg9[%0] : memref<2x!tpu.dma_semaphore, #tpu.memory_space<semaphore_mem>> -> memref<1x!tpu.dma_semaphore, #tpu.memory_space<semaphore_mem>>
    %37 = tpu.memref_squeeze %36 : memref<1x!tpu.dma_semaphore, #tpu.memory_space<semaphore_mem>> -> memref<!tpu.dma_semaphore, #tpu.memory_space<semaphore_mem>>
    tpu.wait_dma2 semaphore(%37 : memref<!tpu.dma_semaphore, #tpu.memory_space<semaphore_mem>>) src(%33 : memref<1x128xf32, #tpu.memory_space<any>>) dst(%35 : memref<1x128xf32, #tpu.memory_space<vmem>>)
    %c0_i32_24 = arith.constant 0 : i32
    %c0_i32_25 = arith.constant 0 : i32
    %38 = tpu.memref_slice %arg3[%c0_i32_24, %c0_i32_25] : memref<64x128xf32, #tpu.memory_space<any>> -> memref<1x128xf32, #tpu.memory_space<any>>
    %c6_i32 = arith.constant 6 : i32
    %c0_i32_26 = arith.constant 0 : i32
    %39 = tpu.memref_slice %arg8[%0, %c6_i32, %c0_i32_26] : memref<2x16x128xf32, #tpu.memory_space<vmem>> -> memref<1x1x128xf32, #tpu.memory_space<vmem>>
    %40 = tpu.memref_squeeze %39 : memref<1x1x128xf32, #tpu.memory_space<vmem>> -> memref<1x128xf32, #tpu.memory_space<vmem>>
    %41 = tpu.memref_slice %arg9[%0] : memref<2x!tpu.dma_semaphore, #tpu.memory_space<semaphore_mem>> -> memref<1x!tpu.dma_semaphore, #tpu.memory_space<semaphore_mem>>
    %42 = tpu.memref_squeeze %41 : memref<1x!tpu.dma_semaphore, #tpu.memory_space<semaphore_mem>> -> memref<!tpu.dma_semaphore, #tpu.memory_space<semaphore_mem>>
    tpu.wait_dma2 semaphore(%42 : memref<!tpu.dma_semaphore, #tpu.memory_space<semaphore_mem>>) src(%38 : memref<1x128xf32, #tpu.memory_space<any>>) dst(%40 : memref<1x128xf32, #tpu.memory_space<vmem>>)
    %c0_i32_27 = arith.constant 0 : i32
    %c0_i32_28 = arith.constant 0 : i32
    %43 = tpu.memref_slice %arg3[%c0_i32_27, %c0_i32_28] : memref<64x128xf32, #tpu.memory_space<any>> -> memref<1x128xf32, #tpu.memory_space<any>>
    %c7_i32 = arith.constant 7 : i32
    %c0_i32_29 = arith.constant 0 : i32
    %44 = tpu.memref_slice %arg8[%0, %c7_i32, %c0_i32_29] : memref<2x16x128xf32, #tpu.memory_space<vmem>> -> memref<1x1x128xf32, #tpu.memory_space<vmem>>
    %45 = tpu.memref_squeeze %44 : memref<1x1x128xf32, #tpu.memory_space<vmem>> -> memref<1x128xf32, #tpu.memory_space<vmem>>
    %46 = tpu.memref_slice %arg9[%0] : memref<2x!tpu.dma_semaphore, #tpu.memory_space<semaphore_mem>> -> memref<1x!tpu.dma_semaphore, #tpu.memory_space<semaphore_mem>>
    %47 = tpu.memref_squeeze %46 : memref<1x!tpu.dma_semaphore, #tpu.memory_space<semaphore_mem>> -> memref<!tpu.dma_semaphore, #tpu.memory_space<semaphore_mem>>
    tpu.wait_dma2 semaphore(%47 : memref<!tpu.dma_semaphore, #tpu.memory_space<semaphore_mem>>) src(%43 : memref<1x128xf32, #tpu.memory_space<any>>) dst(%45 : memref<1x128xf32, #tpu.memory_space<vmem>>)
    %c0_i32_30 = arith.constant 0 : i32
    %c0_i32_31 = arith.constant 0 : i32
    %48 = tpu.memref_slice %arg3[%c0_i32_30, %c0_i32_31] : memref<64x128xf32, #tpu.memory_space<any>> -> memref<1x128xf32, #tpu.memory_space<any>>
    %c8_i32 = arith.constant 8 : i32
    %c0_i32_32 = arith.constant 0 : i32
    %49 = tpu.memref_slice %arg8[%0, %c8_i32, %c0_i32_32] : memref<2x16x128xf32, #tpu.memory_space<vmem>> -> memref<1x1x128xf32, #tpu.memory_space<vmem>>
    %50 = tpu.memref_squeeze %49 : memref<1x1x128xf32, #tpu.memory_space<vmem>> -> memref<1x128xf32, #tpu.memory_space<vmem>>
    %51 = tpu.memref_slice %arg9[%0] : memref<2x!tpu.dma_semaphore, #tpu.memory_space<semaphore_mem>> -> memref<1x!tpu.dma_semaphore, #tpu.memory_space<semaphore_mem>>
    %52 = tpu.memref_squeeze %51 : memref<1x!tpu.dma_semaphore, #tpu.memory_space<semaphore_mem>> -> memref<!tpu.dma_semaphore, #tpu.memory_space<semaphore_mem>>
    tpu.wait_dma2 semaphore(%52 : memref<!tpu.dma_semaphore, #tpu.memory_space<semaphore_mem>>) src(%48 : memref<1x128xf32, #tpu.memory_space<any>>) dst(%50 : memref<1x128xf32, #tpu.memory_space<vmem>>)
    %c0_i32_33 = arith.constant 0 : i32
    %c0_i32_34 = arith.constant 0 : i32
    %53 = tpu.memref_slice %arg3[%c0_i32_33, %c0_i32_34] : memref<64x128xf32, #tpu.memory_space<any>> -> memref<1x128xf32, #tpu.memory_space<any>>
    %c9_i32 = arith.constant 9 : i32
    %c0_i32_35 = arith.constant 0 : i32
    %54 = tpu.memref_slice %arg8[%0, %c9_i32, %c0_i32_35] : memref<2x16x128xf32, #tpu.memory_space<vmem>> -> memref<1x1x128xf32, #tpu.memory_space<vmem>>
    %55 = tpu.memref_squeeze %54 : memref<1x1x128xf32, #tpu.memory_space<vmem>> -> memref<1x128xf32, #tpu.memory_space<vmem>>
    %56 = tpu.memref_slice %arg9[%0] : memref<2x!tpu.dma_semaphore, #tpu.memory_space<semaphore_mem>> -> memref<1x!tpu.dma_semaphore, #tpu.memory_space<semaphore_mem>>
    %57 = tpu.memref_squeeze %56 : memref<1x!tpu.dma_semaphore, #tpu.memory_space<semaphore_mem>> -> memref<!tpu.dma_semaphore, #tpu.memory_space<semaphore_mem>>
    tpu.wait_dma2 semaphore(%57 : memref<!tpu.dma_semaphore, #tpu.memory_space<semaphore_mem>>) src(%53 : memref<1x128xf32, #tpu.memory_space<any>>) dst(%55 : memref<1x128xf32, #tpu.memory_space<vmem>>)
    %c0_i32_36 = arith.constant 0 : i32
    %c0_i32_37 = arith.constant 0 : i32
    %58 = tpu.memref_slice %arg3[%c0_i32_36, %c0_i32_37] : memref<64x128xf32, #tpu.memory_space<any>> -> memref<1x128xf32, #tpu.memory_space<any>>
    %c10_i32 = arith.constant 10 : i32
    %c0_i32_38 = arith.constant 0 : i32
    %59 = tpu.memref_slice %arg8[%0, %c10_i32, %c0_i32_38] : memref<2x16x128xf32, #tpu.memory_space<vmem>> -> memref<1x1x128xf32, #tpu.memory_space<vmem>>
    %60 = tpu.memref_squeeze %59 : memref<1x1x128xf32, #tpu.memory_space<vmem>> -> memref<1x128xf32, #tpu.memory_space<vmem>>
    %61 = tpu.memref_slice %arg9[%0] : memref<2x!tpu.dma_semaphore, #tpu.memory_space<semaphore_mem>> -> memref<1x!tpu.dma_semaphore, #tpu.memory_space<semaphore_mem>>
    %62 = tpu.memref_squeeze %61 : memref<1x!tpu.dma_semaphore, #tpu.memory_space<semaphore_mem>> -> memref<!tpu.dma_semaphore, #tpu.memory_space<semaphore_mem>>
    tpu.wait_dma2 semaphore(%62 : memref<!tpu.dma_semaphore, #tpu.memory_space<semaphore_mem>>) src(%58 : memref<1x128xf32, #tpu.memory_space<any>>) dst(%60 : memref<1x128xf32, #tpu.memory_space<vmem>>)
    %c0_i32_39 = arith.constant 0 : i32
    %c0_i32_40 = arith.constant 0 : i32
    %63 = tpu.memref_slice %arg3[%c0_i32_39, %c0_i32_40] : memref<64x128xf32, #tpu.memory_space<any>> -> memref<1x128xf32, #tpu.memory_space<any>>
    %c11_i32 = arith.constant 11 : i32
    %c0_i32_41 = arith.constant 0 : i32
    %64 = tpu.memref_slice %arg8[%0, %c11_i32, %c0_i32_41] : memref<2x16x128xf32, #tpu.memory_space<vmem>> -> memref<1x1x128xf32, #tpu.memory_space<vmem>>
    %65 = tpu.memref_squeeze %64 : memref<1x1x128xf32, #tpu.memory_space<vmem>> -> memref<1x128xf32, #tpu.memory_space<vmem>>
    %66 = tpu.memref_slice %arg9[%0] : memref<2x!tpu.dma_semaphore, #tpu.memory_space<semaphore_mem>> -> memref<1x!tpu.dma_semaphore, #tpu.memory_space<semaphore_mem>>
    %67 = tpu.memref_squeeze %66 : memref<1x!tpu.dma_semaphore, #tpu.memory_space<semaphore_mem>> -> memref<!tpu.dma_semaphore, #tpu.memory_space<semaphore_mem>>
    tpu.wait_dma2 semaphore(%67 : memref<!tpu.dma_semaphore, #tpu.memory_space<semaphore_mem>>) src(%63 : memref<1x128xf32, #tpu.memory_space<any>>) dst(%65 : memref<1x128xf32, #tpu.memory_space<vmem>>)
    %c0_i32_42 = arith.constant 0 : i32
    %c0_i32_43 = arith.constant 0 : i32
    %68 = tpu.memref_slice %arg3[%c0_i32_42, %c0_i32_43] : memref<64x128xf32, #tpu.memory_space<any>> -> memref<1x128xf32, #tpu.memory_space<any>>
    %c12_i32 = arith.constant 12 : i32
    %c0_i32_44 = arith.constant 0 : i32
    %69 = tpu.memref_slice %arg8[%0, %c12_i32, %c0_i32_44] : memref<2x16x128xf32, #tpu.memory_space<vmem>> -> memref<1x1x128xf32, #tpu.memory_space<vmem>>
    %70 = tpu.memref_squeeze %69 : memref<1x1x128xf32, #tpu.memory_space<vmem>> -> memref<1x128xf32, #tpu.memory_space<vmem>>
    %71 = tpu.memref_slice %arg9[%0] : memref<2x!tpu.dma_semaphore, #tpu.memory_space<semaphore_mem>> -> memref<1x!tpu.dma_semaphore, #tpu.memory_space<semaphore_mem>>
    %72 = tpu.memref_squeeze %71 : memref<1x!tpu.dma_semaphore, #tpu.memory_space<semaphore_mem>> -> memref<!tpu.dma_semaphore, #tpu.memory_space<semaphore_mem>>
    tpu.wait_dma2 semaphore(%72 : memref<!tpu.dma_semaphore, #tpu.memory_space<semaphore_mem>>) src(%68 : memref<1x128xf32, #tpu.memory_space<any>>) dst(%70 : memref<1x128xf32, #tpu.memory_space<vmem>>)
    %c0_i32_45 = arith.constant 0 : i32
    %c0_i32_46 = arith.constant 0 : i32
    %73 = tpu.memref_slice %arg3[%c0_i32_45, %c0_i32_46] : memref<64x128xf32, #tpu.memory_space<any>> -> memref<1x128xf32, #tpu.memory_space<any>>
    %c13_i32 = arith.constant 13 : i32
    %c0_i32_47 = arith.constant 0 : i32
    %74 = tpu.memref_slice %arg8[%0, %c13_i32, %c0_i32_47] : memref<2x16x128xf32, #tpu.memory_space<vmem>> -> memref<1x1x128xf32, #tpu.memory_space<vmem>>
    %75 = tpu.memref_squeeze %74 : memref<1x1x128xf32, #tpu.memory_space<vmem>> -> memref<1x128xf32, #tpu.memory_space<vmem>>
    %76 = tpu.memref_slice %arg9[%0] : memref<2x!tpu.dma_semaphore, #tpu.memory_space<semaphore_mem>> -> memref<1x!tpu.dma_semaphore, #tpu.memory_space<semaphore_mem>>
    %77 = tpu.memref_squeeze %76 : memref<1x!tpu.dma_semaphore, #tpu.memory_space<semaphore_mem>> -> memref<!tpu.dma_semaphore, #tpu.memory_space<semaphore_mem>>
    tpu.wait_dma2 semaphore(%77 : memref<!tpu.dma_semaphore, #tpu.memory_space<semaphore_mem>>) src(%73 : memref<1x128xf32, #tpu.memory_space<any>>) dst(%75 : memref<1x128xf32, #tpu.memory_space<vmem>>)
    %c0_i32_48 = arith.constant 0 : i32
    %c0_i32_49 = arith.constant 0 : i32
    %78 = tpu.memref_slice %arg3[%c0_i32_48, %c0_i32_49] : memref<64x128xf32, #tpu.memory_space<any>> -> memref<1x128xf32, #tpu.memory_space<any>>
    %c14_i32 = arith.constant 14 : i32
    %c0_i32_50 = arith.constant 0 : i32
    %79 = tpu.memref_slice %arg8[%0, %c14_i32, %c0_i32_50] : memref<2x16x128xf32, #tpu.memory_space<vmem>> -> memref<1x1x128xf32, #tpu.memory_space<vmem>>
    %80 = tpu.memref_squeeze %79 : memref<1x1x128xf32, #tpu.memory_space<vmem>> -> memref<1x128xf32, #tpu.memory_space<vmem>>
    %81 = tpu.memref_slice %arg9[%0] : memref<2x!tpu.dma_semaphore, #tpu.memory_space<semaphore_mem>> -> memref<1x!tpu.dma_semaphore, #tpu.memory_space<semaphore_mem>>
    %82 = tpu.memref_squeeze %81 : memref<1x!tpu.dma_semaphore, #tpu.memory_space<semaphore_mem>> -> memref<!tpu.dma_semaphore, #tpu.memory_space<semaphore_mem>>
    tpu.wait_dma2 semaphore(%82 : memref<!tpu.dma_semaphore, #tpu.memory_space<semaphore_mem>>) src(%78 : memref<1x128xf32, #tpu.memory_space<any>>) dst(%80 : memref<1x128xf32, #tpu.memory_space<vmem>>)
    %c0_i32_51 = arith.constant 0 : i32
    %c0_i32_52 = arith.constant 0 : i32
    %83 = tpu.memref_slice %arg3[%c0_i32_51, %c0_i32_52] : memref<64x128xf32, #tpu.memory_space<any>> -> memref<1x128xf32, #tpu.memory_space<any>>
    %c15_i32 = arith.constant 15 : i32
    %c0_i32_53 = arith.constant 0 : i32
    %84 = tpu.memref_slice %arg8[%0, %c15_i32, %c0_i32_53] : memref<2x16x128xf32, #tpu.memory_space<vmem>> -> memref<1x1x128xf32, #tpu.memory_space<vmem>>
    %85 = tpu.memref_squeeze %84 : memref<1x1x128xf32, #tpu.memory_space<vmem>> -> memref<1x128xf32, #tpu.memory_space<vmem>>
    %86 = tpu.memref_slice %arg9[%0] : memref<2x!tpu.dma_semaphore, #tpu.memory_space<semaphore_mem>> -> memref<1x!tpu.dma_semaphore, #tpu.memory_space<semaphore_mem>>
    %87 = tpu.memref_squeeze %86 : memref<1x!tpu.dma_semaphore, #tpu.memory_space<semaphore_mem>> -> memref<!tpu.dma_semaphore, #tpu.memory_space<semaphore_mem>>
    tpu.wait_dma2 semaphore(%87 : memref<!tpu.dma_semaphore, #tpu.memory_space<semaphore_mem>>) src(%83 : memref<1x128xf32, #tpu.memory_space<any>>) dst(%85 : memref<1x128xf32, #tpu.memory_space<vmem>>)
    %88 = arith.index_cast %0 : i32 to index
    %c0 = arith.constant 0 : index
    %c0_54 = arith.constant 0 : index
    %89 = vector.load %arg8[%88, %c0, %c0_54] : memref<2x16x128xf32, #tpu.memory_space<vmem>>, vector<1x16x128xf32>
    %90 = vector.shape_cast %89 : vector<1x16x128xf32> to vector<16x128xf32>
    %c0_55 = arith.constant 0 : index
    %c0_56 = arith.constant 0 : index
    %91 = vector.load %arg4[%c0_55, %c0_56] : memref<16x128xf32, #tpu.memory_space<vmem>>, vector<16x128xf32>
    %92 = arith.addf %90, %91 : vector<16x128xf32>
    %cst = arith.constant dense<0.000000e+00> : vector<16xf32>
    %93 = vector.multi_reduction <add>, %92, %cst [1] : vector<16x128xf32> to vector<16xf32>
    %94 = vector.shape_cast %93 : vector<16xf32> to vector<16x1xf32>
    %cst_57 = arith.constant 1.280000e+02 : f32
    %95 = vector.broadcast %cst_57 : f32 to vector<16x1xf32>
    %96 = arith.divf %94, %95 : vector<16x1xf32>
    %97 = arith.mulf %92, %92 : vector<16x128xf32>
    %cst_58 = arith.constant dense<0.000000e+00> : vector<16xf32>
    %98 = vector.multi_reduction <add>, %97, %cst_58 [1] : vector<16x128xf32> to vector<16xf32>
    %99 = vector.shape_cast %98 : vector<16xf32> to vector<16x1xf32>
    %cst_59 = arith.constant 1.280000e+02 : f32
    %100 = vector.broadcast %cst_59 : f32 to vector<16x1xf32>
    %101 = arith.divf %99, %100 : vector<16x1xf32>
    %102 = arith.mulf %96, %96 : vector<16x1xf32>
    %103 = arith.subf %101, %102 : vector<16x1xf32>
    %cst_60 = arith.constant 9.99999996E-13 : f32
    %104 = vector.broadcast %cst_60 : f32 to vector<16x1xf32>
    %105 = arith.addf %103, %104 : vector<16x1xf32>
    %106 = math.rsqrt %105 : vector<16x1xf32>
    %107 = vector.broadcast %96 : vector<16x1xf32> to vector<16x128xf32>
    %108 = arith.subf %92, %107 : vector<16x128xf32>
    %109 = vector.broadcast %106 : vector<16x1xf32> to vector<16x128xf32>
    %110 = arith.mulf %108, %109 : vector<16x128xf32>
    %c0_61 = arith.constant 0 : index
    %c0_62 = arith.constant 0 : index
    %111 = vector.load %arg5[%c0_61, %c0_62] : memref<1x128xf32, #tpu.memory_space<vmem>>, vector<1x128xf32>
    %112 = vector.broadcast %111 : vector<1x128xf32> to vector<16x128xf32>
    %113 = arith.mulf %110, %112 : vector<16x128xf32>
    %c0_63 = arith.constant 0 : index
    %c0_64 = arith.constant 0 : index
    %114 = vector.load %arg6[%c0_63, %c0_64] : memref<1x128xf32, #tpu.memory_space<vmem>>, vector<1x128xf32>
    %115 = vector.broadcast %114 : vector<1x128xf32> to vector<16x128xf32>
    %116 = arith.addf %113, %115 : vector<16x128xf32>
    %c0_65 = arith.constant 0 : index
    %c0_66 = arith.constant 0 : index
    %117 = vector.load %arg7[%c0_65, %c0_66] : memref<16x128xf32, #tpu.memory_space<vmem>>, vector<16x128xf32>
    tpu.vector_store %arg7[%c0_65, %c0_66], %116 {strides = array<i32>} : memref<16x128xf32, #tpu.memory_space<vmem>>, vector<16x128xf32>,
    return
  }
  func.func @transform_1(%arg0: i32, %arg1: i32, %arg2: memref<32xi32, #tpu.memory_space<smem>>) -> (i32, i32) {
    %c0_i32 = arith.constant 0 : i32
    %c0_i32_0 = arith.constant 0 : i32
    return %arg1, %c0_i32 : i32, i32
  }
  func.func @transform_2(%arg0: i32, %arg1: i32, %arg2: memref<32xi32, #tpu.memory_space<smem>>) -> (i32, i32) {
    %c0_i32 = arith.constant 0 : i32
    %c0_i32_0 = arith.constant 0 : i32
    %c0_i32_1 = arith.constant 0 : i32
    return %c0_i32, %c0_i32_0 : i32, i32
  }
  func.func @transform_3(%arg0: i32, %arg1: i32, %arg2: memref<32xi32, #tpu.memory_space<smem>>) -> (i32, i32) {
    %c0_i32 = arith.constant 0 : i32
    %c0_i32_0 = arith.constant 0 : i32
    %c0_i32_1 = arith.constant 0 : i32
    return %c0_i32, %c0_i32_0 : i32, i32
  }
  func.func @transform_4(%arg0: i32, %arg1: i32, %arg2: memref<32xi32, #tpu.memory_space<smem>>) -> (i32, i32) {
    %c1_i32 = arith.constant 1 : i32
    %0 = arith.muli %arg0, %c1_i32 : i32
    %1 = arith.addi %0, %arg1 : i32
    %c0_i32 = arith.constant 0 : i32
    %c0_i32_0 = arith.constant 0 : i32
    return %1, %c0_i32 : i32, i32
  }
}

</mosaic_0001>

<bundles_post_ra>
// kernel: embeddings_forward.1
= control target key start
LH: loop header
LB: loop body
LE: loop exit
PB: predicated region body
PF: predicated region fallthrough
CT: control target
= control target key end

     0   :  { %s2068_s0 = inlined_call_operand.vmem [shape: s32[32], index: 0, kind: input, shape index: {}]   ;;  %s2069_s1 = inlined_call_operand.hbm [shape: f32[64,128], index: 1, kind: input, shape index: {}]   ;;  %s2070_s2 = inlined_call_operand.vmem [shape: f32[16,128], index: 2, kind: input, shape index: {}]   ;;  %s2071_s3 = inlined_call_operand.vmem [shape: f32[1,128], index: 3, kind: input, shape index: {}]   ;;  %s2072_s4 = inlined_call_operand.vmem [shape: f32[1,128], index: 4, kind: input, shape index: {}]   ;;  %s2073_s5 = inlined_call_operand.hbm [shape: f32[32,128], index: 5, kind: output, shape index: {}]  }
   0x1   :  { %s10_s20 = sshll.u32 %s2068_s0, 4  ;;  %s11_s20 = int_to_ptr.vmem [resolvable:$true] %s10_s20 }
   0x2   :  { %s1190_s21 = scalar_lea.vmem %s11_s20, 16  ;;  %p1195_p1 = scmp.lt.s32.totalorder %s11_s20, %s11_s20 }
   0x3   :  { %p1191_p0 = scmp.ne.s32.totalorder %s11_s20, %s1190_s21  ;;  %p1196_p2 = scmp.lt.s32.totalorder %s1190_s21, %s1190_s21 }
   0x5   :  { %p1197_p3 = por %p1196_p2, %p1195_p1 }
   0x7   :  { %p1198_p4 = pnand %p1197_p3, %p1191_p0 }
   0x9   :  { %1201 = shalt.err (!%p1198_p4)  }
   0xa   :  { %s1636_s22 = smov [#allocation5]  }
   0xb   :  { %13 = dma.vmem_to_smem %s11_s20, 16, %s1636_s22, [#allocation4] }
   0xc   :  { %1604 = dma.done.wait [#allocation4], 16 }
   0xd   :  { %1605 = vsyncadd [#allocation4], 4294967280 }
   0xe   :  { %15 = sfence }
   0xf   :  { %16 = vsyncpa [#allocation7], 0 }
  0x10   :  { %18 = vsyncpa [#allocation7 + $0x1], 0  ;;  %s1689_s23 = smov 0   ;;  %s1691_s24 = smov 0  }
  0x11   :  { %s1693_s0 = smov 0   ;;  %s1695_s25 = smov 0  }
  0x12   :  { %s1697_s26 = smov 0   ;;  %s1699_s27 = smov 0  }
  0x13 LB: > { %2080 = sst [smem:[#allocation77_spill]] %s1614_s23  ;;  %s1047_s28 = sadd.s32 4294967295, %s1634_s27   ;;  %s1634_s27 = sphi %s1699_s27, %s24_s27   ;;  %s1630_s26 = sphi %s1697_s26, %s2094_s26   ;;  %s1626_s25 = sphi %s1695_s25, %s2093_s25   ;;  %s1622_s0 = sphi %s1693_s0, %s2097_s0   ;;  %s1618_s24 = sphi %s1691_s24, %s2096_s24   ;;  %s1614_s23 = sphi %s1689_s23, %s2095_s23  }
  0x14   : > { %2081 = sst [smem:[#allocation78_spill]] %s1622_s0  ;;  %s1048_s29 = sadd.s32 4294967294, %s1634_s27  }
  0x15   : > { %2082 = sst [smem:[#allocation79_spill]] %s1630_s26  ;;  %s36_s30 = sadd.s32 1, %s1630_s26 }
  0x16   : > { %s113_s6 = sadd.s32 1, %s1622_s0  ;;  %p38_p5 = scmp.ge.s32.totalorder %s36_s30, 2 }
  0x17   : > { %p123_p6 = scmp.ne.s32.totalorder %s1622_s0, %s1618_s24  ;;  %p124_p7 = scmp.eq.s32.totalorder %s1047_s28, 1 }
  0x18   : > { %p129_p8 = scmp.ne.s32.totalorder %s1618_s24, %s1614_s23  ;;  %s2099_s30 = smov (%p38_p5, %s36_s30), 0 }
  0x19   : > { %2083 = sst [smem:[#allocation80_spill]] %s2099_s30  ;;  %p1729_p9 = por %p124_p7, %p123_p6 }
  0x1a   : > { %p130_p10 = scmp.eq.s32.totalorder %s1048_s29, 1  ;;  %s110_s8 = ssub.s32 %s1630_s26, %s2099_s30 }
  0x1b   : > { %p1051_p11 = scmp.ge.s32.totalorder %s1634_s27, 1  ;;  %p111_p12 = scmp.eq.s32.totalorder %s110_s8, 0 }
  0x1c   : > { %p1736_p13 = por %p130_p10, %p129_p8  ;;  %p163_p0 = scmp.lt.s32.totalorder %s1634_s27, 3 }
  0x1d   : > { %s1742_s10 = scalar_select %p111_p12, %s1622_s0, %s113_s6  }
  0x1e   : > { %s2085_s9 = scalar_select %p1736_p13, 1, 0 }
  0x1f   : > { %2087 = sst [smem:[#allocation82_spill]] %s1742_s10  ;;  %p164_p1 = pnand %p1051_p11, %p163_p0 }
  0x20   : > { %2086 = sst [smem:[#allocation81_spill]] %s2085_s9  ;;  %s2074_s11 = sand.u32 (!%p164_p1), 1, %s1618_s24  }
  0x21   : > { %167 = sbr.rel (%p164_p1) target bundleno = 552 (0x228), region = 32  ;;  %s1746_s12 = sshll.u32 (!%p164_p1), %s1626_s25, 4 }
  0x22   : > { %s1750_s13 = sshll.u32 (!%p164_p1), %s2074_s11, 4  ;;  %s206_s14 = sld [smem:[#allocation5 + %s1746_s12]] (!%p164_p1) }
  0x23   : > { %s1637_s15 = smov (!%p164_p1), [#allocation2]   ;;  %s220_s17 = sadd.s32 (!%p164_p1), 1, %s1746_s12 }
  0x24   : > { %s216_s16 = sshll.u32 (!%p164_p1), %s1637_s15, 4  ;;  %s1756_s18 = sld [smem:[#allocation5 + %s220_s17]] (!%p164_p1)  ;;  %s1754_s16 = int_to_ptr.vmem [resolvable:$true] %s216_s16 }
  0x25   : > { %s236_s19 = sadd.s32 (!%p164_p1), 2, %s1746_s12  ;;  %s1638_s20 = smov (!%p164_p1), [#allocation2 + $0x1]  }
  0x26   : > { %s232_s21 = sshll.u32 %s1638_s20, 4  ;;  %s1759_s22 = sld [smem:[#allocation5 + %s236_s19]]  ;;  %s1761_s21 = int_to_ptr.vmem [resolvable:$true] %s232_s21 }
  0x27   : > { %s1769_s26 = scalar_lea.hbm %s2069_s1, 1024 }
  0x28   : > { %s1054_s28 = sshll.u32 %s206_s14, 4 }
  0x29   : > { %s208_s8 = scalar_lea.hbm %s2069_s1, %s1054_s28 }
  0x2a   : > { %s1202_s11 = scalar_lea.hbm %s208_s8, 16  ;;  %p1205_p3 = scmp.lt.s32.totalorder %s208_s8, %s2069_s1 }
  0x2b   : > { %p1203_p2 = scmp.ne.s32.totalorder %s208_s8, %s1202_s11  ;;  %p1206_p4 = scmp.lt.s32.totalorder %s1769_s26, %s1202_s11 }
  0x2d   : > { %p1207_p5 = por %p1206_p4, %p1205_p3 }
  0x2f   : > { %p1208_p6 = pnand %p1207_p5, %p1203_p2 }
  0x31   : > { %1211 = shalt.err (!%p1208_p6)  }
  0x32   : > { %s1212_s14 = scalar_lea.vmem %s1754_s16, 16  ;;  %s1778_s19 = scalar_lea.vmem %s1754_s16, 512 }
  0x33   : > { %p1213_p7 = scmp.ne.s32.totalorder %s1754_s16, %s1212_s14  ;;  %p1217_p8 = scmp.lt.s32.totalorder %s1754_s16, %s1754_s16 }
  0x34   : > { %p1218_p10 = scmp.lt.s32.totalorder %s1778_s19, %s1212_s14 }
  0x36   : > { %p1219_p11 = por %p1218_p10, %p1217_p8 }
  0x38   : > { %p1220_p12 = pnand %p1219_p11, %p1213_p7 }
  0x3a   : > { %1223 = shalt.err (!%p1220_p12)  }
  0x3b   : > { %219 = dma.hbm_to_vmem [thread:$0]  %s208_s8, 16, %s1754_s16, [#allocation3] }
  0x3c   : > { %s1055_s30 = sshll.u32 %s1756_s18, 4  ;;  %s1639_s10 = smov [#allocation2 + $0x2]  }
  0x3d   : > { %s248_s11 = sshll.u32 %s1639_s10, 4  ;;  %s223_s29 = scalar_lea.hbm %s2069_s1, %s1055_s30  ;;  %s1788_s11 = int_to_ptr.vmem [resolvable:$true] %s248_s11 }
  0x3e   : > { %s1224_s6 = scalar_lea.hbm %s223_s29, 16  ;;  %p1227_p1 = scmp.lt.s32.totalorder %s223_s29, %s2069_s1 }
  0x3f   : > { %p1225_p0 = scmp.ne.s32.totalorder %s223_s29, %s1224_s6  ;;  %p1228_p2 = scmp.lt.s32.totalorder %s1769_s26, %s1224_s6 }
  0x41   : > { %p1229_p3 = por %p1228_p2, %p1227_p1 }
  0x43   : > { %p1230_p4 = pnand %p1229_p3, %p1225_p0 }
  0x45   : > { %1233 = shalt.err (!%p1230_p4)  }
  0x46   : > { %s1234_s18 = scalar_lea.vmem %s1761_s21, 16  ;;  %p1239_p6 = scmp.lt.s32.totalorder %s1761_s21, %s1754_s16 }
  0x47   : > { %p1235_p5 = scmp.ne.s32.totalorder %s1761_s21, %s1234_s18  ;;  %p1240_p7 = scmp.lt.s32.totalorder %s1778_s19, %s1234_s18 }
  0x49   : > { %p1241_p8 = por %p1240_p7, %p1239_p6 }
  0x4b   : > { %p1242_p10 = pnand %p1241_p8, %p1235_p5 }
  0x4d   : > { %1245 = shalt.err (!%p1242_p10)  }
  0x4e   : > { %235 = dma.hbm_to_vmem [thread:$0]  %s223_s29, 16, %s1761_s21, [#allocation3] }
  0x4f   : > { %s1056_s8 = sshll.u32 %s1759_s22, 4  ;;  %s252_s14 = sadd.s32 3, %s1746_s12 }
  0x50   : > { %s239_s20 = scalar_lea.hbm %s2069_s1, %s1056_s8  ;;  %s253_s28 = sld [smem:[#allocation5 + %s252_s14]] }
  0x51   : > { %s1246_s6 = scalar_lea.hbm %s239_s20, 16  ;;  %p1249_p12 = scmp.lt.s32.totalorder %s239_s20, %s2069_s1 }
  0x52   : > { %p1247_p11 = scmp.ne.s32.totalorder %s239_s20, %s1246_s6  ;;  %p1250_p0 = scmp.lt.s32.totalorder %s1769_s26, %s1246_s6 }
  0x54   : > { %p1251_p1 = por %p1250_p0, %p1249_p12 }
  0x56   : > { %p1252_p2 = pnand %p1251_p1, %p1247_p11 }
  0x58   : > { %1255 = shalt.err (!%p1252_p2)  }
  0x59   : > { %s1256_s21 = scalar_lea.vmem %s1788_s11, 16  ;;  %p1261_p4 = scmp.lt.s32.totalorder %s1788_s11, %s1754_s16 }
  0x5a   : > { %p1257_p3 = scmp.ne.s32.totalorder %s1788_s11, %s1256_s21  ;;  %p1262_p5 = scmp.lt.s32.totalorder %s1778_s19, %s1256_s21 }
  0x5c   : > { %p1263_p6 = por %p1262_p5, %p1261_p4 }
  0x5e   : > { %p1264_p7 = pnand %p1263_p6, %p1257_p3 }
  0x60   : > { %1267 = shalt.err (!%p1264_p7)  }
  0x61   : > { %251 = dma.hbm_to_vmem [thread:$0]  %s239_s20, 16, %s1788_s11, [#allocation3] }
  0x62   : > { %s268_s22 = sadd.s32 4, %s1746_s12  ;;  %s1640_s29 = smov [#allocation2 + $0x3]  }
  0x63   : > { %s264_s18 = sshll.u32 %s1640_s29, 4  ;;  %s269_s8 = sld [smem:[#allocation5 + %s268_s22]]  ;;  %s265_s18 = int_to_ptr.vmem [resolvable:$true] %s264_s18 }
  0x64   : > { %s1641_s14 = smov [#allocation2 + $0x4]   ;;  %s284_s10 = sadd.s32 5, %s1746_s12 }
  0x65   : > { %s280_s30 = sshll.u32 %s1641_s14, 4  ;;  %s1057_s6 = sshll.u32 %s253_s28, 4  ;;  %s1817_s30 = int_to_ptr.vmem [resolvable:$true] %s280_s30 }
  0x66   : > { %s255_s21 = scalar_lea.hbm %s2069_s1, %s1057_s6  ;;  %s1822_s0 = sld [smem:[#allocation5 + %s284_s10]] }
  0x67   : > { %s1268_s9 = scalar_lea.hbm %s255_s21, 16  ;;  %p1271_p10 = scmp.lt.s32.totalorder %s255_s21, %s2069_s1 }
  0x68   : > { %p1269_p8 = scmp.ne.s32.totalorder %s255_s21, %s1268_s9  ;;  %p1272_p11 = scmp.lt.s32.totalorder %s1769_s26, %s1268_s9 }
  0x6a   : > { %p1273_p12 = por %p1272_p11, %p1271_p10 }
  0x6c   : > { %p1274_p0 = pnand %p1273_p12, %p1269_p8 }
  0x6e   : > { %1277 = shalt.err (!%p1274_p0)  }
  0x6f   : > { %s1278_s22 = scalar_lea.vmem %s265_s18, 16  ;;  %p1283_p2 = scmp.lt.s32.totalorder %s265_s18, %s1754_s16 }
  0x70   : > { %p1279_p1 = scmp.ne.s32.totalorder %s265_s18, %s1278_s22  ;;  %p1284_p3 = scmp.lt.s32.totalorder %s1778_s19, %s1278_s22 }
  0x72   : > { %p1285_p4 = por %p1284_p3, %p1283_p2 }
  0x74   : > { %p1286_p5 = pnand %p1285_p4, %p1279_p1 }
  0x76   : > { %1289 = shalt.err (!%p1286_p5)  }
  0x77   : > { %267 = dma.hbm_to_vmem [thread:$0]  %s255_s21, 16, %s265_s18, [#allocation3] }
  0x78   : > { %s1058_s28 = sshll.u32 %s269_s8, 4  ;;  %s1642_s9 = smov [#allocation2 + $0x5]  }
  0x79   : > { %s271_s10 = scalar_lea.hbm %s2069_s1, %s1058_s28  ;;  %s296_s6 = sshll.u32 %s1642_s9, 4  ;;  %s297_s6 = int_to_ptr.vmem [resolvable:$true] %s296_s6 }
  0x7a   : > { %s1290_s15 = scalar_lea.hbm %s271_s10, 16  ;;  %p1293_p7 = scmp.lt.s32.totalorder %s271_s10, %s2069_s1 }
  0x7b   : > { %p1291_p6 = scmp.ne.s32.totalorder %s271_s10, %s1290_s15  ;;  %p1294_p8 = scmp.lt.s32.totalorder %s1769_s26, %s1290_s15 }
  0x7d   : > { %p1295_p10 = por %p1294_p8, %p1293_p7 }
  0x7f   : > { %p1296_p11 = pnand %p1295_p10, %p1291_p6 }
  0x81   : > { %1299 = shalt.err (!%p1296_p11)  }
  0x82   : > { %s1300_s18 = scalar_lea.vmem %s1817_s30, 16  ;;  %p1305_p0 = scmp.lt.s32.totalorder %s1817_s30, %s1754_s16 }
  0x83   : > { %p1301_p12 = scmp.ne.s32.totalorder %s1817_s30, %s1300_s18  ;;  %p1306_p1 = scmp.lt.s32.totalorder %s1778_s19, %s1300_s18 }
  0x85   : > { %p1307_p2 = por %p1306_p1, %p1305_p0 }
  0x87   : > { %p1308_p3 = pnand %p1307_p2, %p1301_p12 }
  0x89   : > { %1311 = shalt.err (!%p1308_p3)  }
  0x8a   : > { %283 = dma.hbm_to_vmem [thread:$0]  %s271_s10, 16, %s1817_s30, [#allocation3] }
  0x8b   : > { %s300_s8 = sadd.s32 6, %s1746_s12  ;;  %s1059_s21 = sshll.u32 %s1822_s0, 4 }
  0x8c   : > { %s301_s20 = sld [smem:[#allocation5 + %s300_s8]]  ;;  %s287_s29 = scalar_lea.hbm %s2069_s1, %s1059_s21 }
  0x8d   : > { %s1312_s14 = scalar_lea.hbm %s287_s29, 16  ;;  %p1315_p5 = scmp.lt.s32.totalorder %s287_s29, %s2069_s1 }
  0x8e   : > { %p1313_p4 = scmp.ne.s32.totalorder %s287_s29, %s1312_s14  ;;  %p1316_p6 = scmp.lt.s32.totalorder %s1769_s26, %s1312_s14 }
  0x90   : > { %p1317_p7 = por %p1316_p6, %p1315_p5 }
  0x92   : > { %p1318_p8 = pnand %p1317_p7, %p1313_p4 }
  0x94   : > { %1321 = shalt.err (!%p1318_p8)  }
  0x95   : > { %s1322_s17 = scalar_lea.vmem %s297_s6, 16  ;;  %p1327_p11 = scmp.lt.s32.totalorder %s297_s6, %s1754_s16 }
  0x96   : > { %p1323_p10 = scmp.ne.s32.totalorder %s297_s6, %s1322_s17  ;;  %p1328_p12 = scmp.lt.s32.totalorder %s1778_s19, %s1322_s17 }
  0x98   : > { %p1329_p0 = por %p1328_p12, %p1327_p11 }
  0x9a   : > { %p1330_p1 = pnand %p1329_p0, %p1323_p10 }
  0x9c   : > { %1333 = shalt.err (!%p1330_p1)  }
  0x9d   : > { %299 = dma.hbm_to_vmem [thread:$0]  %s287_s29, 16, %s297_s6, [#allocation3] }
  0x9e   : > { %s1643_s0 = smov [#allocation2 + $0x6]   ;;  %s316_s10 = sadd.s32 7, %s1746_s12 }
  0x9f   : > { %s312_s30 = sshll.u32 %s1643_s0, 4  ;;  %s317_s11 = sld [smem:[#allocation5 + %s316_s10]]  ;;  %s313_s30 = int_to_ptr.vmem [resolvable:$true] %s312_s30 }
  0xa0   : > { %s332_s18 = sadd.s32 8, %s1746_s12  ;;  %s1060_s8 = sshll.u32 %s301_s20, 4 }
  0xa1   : > { %s1644_s21 = smov [#allocation2 + $0x7]   ;;  %s303_s9 = scalar_lea.hbm %s2069_s1, %s1060_s8 }
  0xa2   : > { %s328_s22 = sshll.u32 %s1644_s21, 4  ;;  %s1334_s15 = scalar_lea.hbm %s303_s9, 16  ;;  %s1859_s22 = int_to_ptr.vmem [resolvable:$true] %s328_s22 }
  0xa3   : > { %p1335_p2 = scmp.ne.s32.totalorder %s303_s9, %s1334_s15  ;;  %p1337_p3 = scmp.lt.s32.totalorder %s303_s9, %s2069_s1 }
  0xa4   : > { %p1338_p4 = scmp.lt.s32.totalorder %s1769_s26, %s1334_s15 }
  0xa6   : > { %p1339_p5 = por %p1338_p4, %p1337_p3 }
  0xa8   : > { %p1340_p6 = pnand %p1339_p5, %p1335_p2 }
  0xaa   : > { %1343 = shalt.err (!%p1340_p6)  }
  0xab   : > { %s1344_s17 = scalar_lea.vmem %s313_s30, 16  ;;  %p1349_p8 = scmp.lt.s32.totalorder %s313_s30, %s1754_s16 }
  0xac   : > { %p1345_p7 = scmp.ne.s32.totalorder %s313_s30, %s1344_s17  ;;  %p1350_p10 = scmp.lt.s32.totalorder %s1778_s19, %s1344_s17 }
  0xae   : > { %p1351_p11 = por %p1350_p10, %p1349_p8 }
  0xb0   : > { %p1352_p12 = pnand %p1351_p11, %p1345_p7 }
  0xb2   : > { %1355 = shalt.err (!%p1352_p12)  }
  0xb3   : > { %315 = dma.hbm_to_vmem [thread:$0]  %s303_s9, 16, %s313_s30, [#allocation3] }
  0xb4   : > { %s333_s20 = sld [smem:[#allocation5 + %s332_s18]]  ;;  %s1061_s0 = sshll.u32 %s317_s11, 4 }
  0xb5   : > { %s1645_s10 = smov [#allocation2 + $0x8]   ;;  %s319_s14 = scalar_lea.hbm %s2069_s1, %s1061_s0 }
  0xb6   : > { %s344_s8 = sshll.u32 %s1645_s10, 4  ;;  %s1356_s15 = scalar_lea.hbm %s319_s14, 16  ;;  %s1870_s8 = int_to_ptr.vmem [resolvable:$true] %s344_s8 }
  0xb7   : > { %p1357_p0 = scmp.ne.s32.totalorder %s319_s14, %s1356_s15  ;;  %p1359_p1 = scmp.lt.s32.totalorder %s319_s14, %s2069_s1 }
  0xb8   : > { %p1360_p2 = scmp.lt.s32.totalorder %s1769_s26, %s1356_s15 }
  0xba   : > { %p1361_p3 = por %p1360_p2, %p1359_p1 }
  0xbc   : > { %p1362_p4 = pnand %p1361_p3, %p1357_p0 }
  0xbe   : > { %1365 = shalt.err (!%p1362_p4)  }
  0xbf   : > { %s1366_s30 = scalar_lea.vmem %s1859_s22, 16  ;;  %p1371_p6 = scmp.lt.s32.totalorder %s1859_s22, %s1754_s16 }
  0xc0   : > { %p1367_p5 = scmp.ne.s32.totalorder %s1859_s22, %s1366_s30  ;;  %p1372_p7 = scmp.lt.s32.totalorder %s1778_s19, %s1366_s30 }
  0xc2   : > { %p1373_p8 = por %p1372_p7, %p1371_p6 }
  0xc4   : > { %p1374_p10 = pnand %p1373_p8, %p1367_p5 }
  0xc6   : > { %1377 = shalt.err (!%p1374_p10)  }
  0xc7   : > { %331 = dma.hbm_to_vmem [thread:$0]  %s319_s14, 16, %s1859_s22, [#allocation3] }
  0xc8   : > { %s348_s11 = sadd.s32 9, %s1746_s12  ;;  %s1646_s9 = smov [#allocation2 + $0x9]  }
  0xc9   : > { %s1883_s18 = sld [smem:[#allocation5 + %s348_s11]]  ;;  %s360_s17 = sshll.u32 %s1646_s9, 4  ;;  %s1885_s17 = int_to_ptr.vmem [resolvable:$true] %s360_s17 }
  0xca   : > { %s1062_s0 = sshll.u32 %s333_s20, 4  ;;  %s364_s15 = sadd.s32 10, %s1746_s12 }
  0xcb   : > { %s335_s28 = scalar_lea.hbm %s2069_s1, %s1062_s0 }
  0xcc   : > { %s1378_s6 = scalar_lea.hbm %s335_s28, 16  ;;  %p1381_p12 = scmp.lt.s32.totalorder %s335_s28, %s2069_s1 }
  0xcd   : > { %p1379_p11 = scmp.ne.s32.totalorder %s335_s28, %s1378_s6  ;;  %p1382_p0 = scmp.lt.s32.totalorder %s1769_s26, %s1378_s6 }
  0xcf   : > { %p1383_p1 = por %p1382_p0, %p1381_p12 }
  0xd1   : > { %p1384_p2 = pnand %p1383_p1, %p1379_p11 }
  0xd3   : > { %1387 = shalt.err (!%p1384_p2)  }
  0xd4   : > { %s1388_s22 = scalar_lea.vmem %s1870_s8, 16  ;;  %p1393_p4 = scmp.lt.s32.totalorder %s1870_s8, %s1754_s16 }
  0xd5   : > { %p1389_p3 = scmp.ne.s32.totalorder %s1870_s8, %s1388_s22  ;;  %p1394_p5 = scmp.lt.s32.totalorder %s1778_s19, %s1388_s22 }
  0xd7   : > { %p1395_p6 = por %p1394_p5, %p1393_p4 }
  0xd9   : > { %p1396_p7 = pnand %p1395_p6, %p1389_p3 }
  0xdb   : > { %1399 = shalt.err (!%p1396_p7)  }
  0xdc   : > { %347 = dma.hbm_to_vmem [thread:$0]  %s335_s28, 16, %s1870_s8, [#allocation3] }
  0xdd   : > { %s365_s20 = sld [smem:[#allocation5 + %s364_s15]]  ;;  %s1647_s14 = smov [#allocation2 + $0xa]  }
  0xde   : > { %s376_s11 = sshll.u32 %s1647_s14, 4  ;;  %s380_s9 = sadd.s32 11, %s1746_s12  ;;  %s1903_s11 = int_to_ptr.vmem [resolvable:$true] %s376_s11 }
  0xdf   : > { %s1063_s0 = sshll.u32 %s1883_s18, 4  ;;  %s1908_s29 = sld [smem:[#allocation5 + %s380_s9]] }
  0xe0   : > { %s351_s6 = scalar_lea.hbm %s2069_s1, %s1063_s0 }
  0xe1   : > { %s1400_s30 = scalar_lea.hbm %s351_s6, 16  ;;  %p1403_p10 = scmp.lt.s32.totalorder %s351_s6, %s2069_s1 }
  0xe2   : > { %p1401_p8 = scmp.ne.s32.totalorder %s351_s6, %s1400_s30  ;;  %p1404_p11 = scmp.lt.s32.totalorder %s1769_s26, %s1400_s30 }
  0xe4   : > { %p1405_p12 = por %p1404_p11, %p1403_p10 }
  0xe6   : > { %p1406_p0 = pnand %p1405_p12, %p1401_p8 }
  0xe8   : > { %1409 = shalt.err (!%p1406_p0)  }
  0xe9   : > { %s1410_s8 = scalar_lea.vmem %s1885_s17, 16  ;;  %p1415_p2 = scmp.lt.s32.totalorder %s1885_s17, %s1754_s16 }
  0xea   : > { %p1411_p1 = scmp.ne.s32.totalorder %s1885_s17, %s1410_s8  ;;  %p1416_p3 = scmp.lt.s32.totalorder %s1778_s19, %s1410_s8 }
  0xec   : > { %p1417_p4 = por %p1416_p3, %p1415_p2 }
  0xee   : > { %p1418_p5 = pnand %p1417_p4, %p1411_p1 }
  0xf0   : > { %1421 = shalt.err (!%p1418_p5)  }
  0xf1   : > { %363 = dma.hbm_to_vmem [thread:$0]  %s351_s6, 16, %s1885_s17, [#allocation3] }
  0xf2   : > { %s396_s23 = sadd.s32 12, %s1746_s12  ;;  %s1064_s18 = sshll.u32 %s365_s20, 4 }
  0xf3   : > { %s1648_s28 = smov [#allocation2 + $0xb]   ;;  %s367_s0 = scalar_lea.hbm %s2069_s1, %s1064_s18 }
  0xf4   : > { %s392_s15 = sshll.u32 %s1648_s28, 4  ;;  %s1422_s10 = scalar_lea.hbm %s367_s0, 16  ;;  %s1924_s15 = int_to_ptr.vmem [resolvable:$true] %s392_s15 }
  0xf5   : > { %p1423_p6 = scmp.ne.s32.totalorder %s367_s0, %s1422_s10  ;;  %p1425_p7 = scmp.lt.s32.totalorder %s367_s0, %s2069_s1 }
  0xf6   : > { %p1426_p8 = scmp.lt.s32.totalorder %s1769_s26, %s1422_s10 }
  0xf8   : > { %p1427_p10 = por %p1426_p8, %p1425_p7 }
  0xfa   : > { %p1428_p11 = pnand %p1427_p10, %p1423_p6 }
  0xfc   : > { %1431 = shalt.err (!%p1428_p11)  }
  0xfd   : > { %s1432_s17 = scalar_lea.vmem %s1903_s11, 16  ;;  %p1437_p0 = scmp.lt.s32.totalorder %s1903_s11, %s1754_s16 }
  0xfe   : > { %p1433_p12 = scmp.ne.s32.totalorder %s1903_s11, %s1432_s17  ;;  %p1438_p1 = scmp.lt.s32.totalorder %s1778_s19, %s1432_s17 }
 0x100   : > { %p1439_p2 = por %p1438_p1, %p1437_p0 }
 0x102   : > { %p1440_p3 = pnand %p1439_p2, %p1433_p12 }
 0x104   : > { %1443 = shalt.err (!%p1440_p3)  }
 0x105   : > { %379 = dma.hbm_to_vmem [thread:$0]  %s367_s0, 16, %s1903_s11, [#allocation3] }
 0x106   : > { %s1065_s20 = sshll.u32 %s1908_s29, 4  ;;  %s397_s6 = sld [smem:[#allocation5 + %s396_s23]] }
 0x107   : > { %s383_s18 = scalar_lea.hbm %s2069_s1, %s1065_s20 }
 0x108   : > { %s1444_s28 = scalar_lea.hbm %s383_s18, 16  ;;  %p1447_p5 = scmp.lt.s32.totalorder %s383_s18, %s2069_s1 }
 0x109   : > { %p1445_p4 = scmp.ne.s32.totalorder %s383_s18, %s1444_s28  ;;  %p1448_p6 = scmp.lt.s32.totalorder %s1769_s26, %s1444_s28 }
 0x10b   : > { %p1449_p7 = por %p1448_p6, %p1447_p5 }
 0x10d   : > { %p1450_p8 = pnand %p1449_p7, %p1445_p4 }
 0x10f   : > { %1453 = shalt.err (!%p1450_p8)  }
 0x110   : > { %s1454_s11 = scalar_lea.vmem %s1924_s15, 16  ;;  %p1459_p11 = scmp.lt.s32.totalorder %s1924_s15, %s1754_s16 }
 0x111   : > { %p1455_p10 = scmp.ne.s32.totalorder %s1924_s15, %s1454_s11  ;;  %p1460_p12 = scmp.lt.s32.totalorder %s1778_s19, %s1454_s11 }
 0x113   : > { %p1461_p0 = por %p1460_p12, %p1459_p11 }
 0x115   : > { %p1462_p1 = pnand %p1461_p0, %p1455_p10 }
 0x117   : > { %1465 = shalt.err (!%p1462_p1)  }
 0x118   : > { %395 = dma.hbm_to_vmem [thread:$0]  %s383_s18, 16, %s1924_s15, [#allocation3] }
 0x119   : > { %s1649_s29 = smov [#allocation2 + $0xc]   ;;  %s412_s0 = sadd.s32 13, %s1746_s12 }
 0x11a   : > { %s408_s23 = sshll.u32 %s1649_s29, 4  ;;  %s413_s10 = sld [smem:[#allocation5 + %s412_s0]]  ;;  %s409_s23 = int_to_ptr.vmem [resolvable:$true] %s408_s23 }
 0x11b   : > { %s428_s21 = sadd.s32 14, %s1746_s12  ;;  %s1066_s30 = sshll.u32 %s397_s6, 4 }
 0x11c   : > { %s1650_s17 = smov [#allocation2 + $0xd]   ;;  %s399_s28 = scalar_lea.hbm %s2069_s1, %s1066_s30 }
 0x11d   : > { %s424_s20 = sshll.u32 %s1650_s17, 4  ;;  %s1466_s14 = scalar_lea.hbm %s399_s28, 16  ;;  %s1955_s20 = int_to_ptr.vmem [resolvable:$true] %s424_s20 }
 0x11e   : > { %p1467_p2 = scmp.ne.s32.totalorder %s399_s28, %s1466_s14  ;;  %p1469_p3 = scmp.lt.s32.totalorder %s399_s28, %s2069_s1 }
 0x11f   : > { %p1470_p4 = scmp.lt.s32.totalorder %s1769_s26, %s1466_s14 }
 0x121   : > { %p1471_p5 = por %p1470_p4, %p1469_p3 }
 0x123   : > { %p1472_p6 = pnand %p1471_p5, %p1467_p2 }
 0x125   : > { %1475 = shalt.err (!%p1472_p6)  }
 0x126   : > { %s1476_s15 = scalar_lea.vmem %s409_s23, 16  ;;  %p1481_p8 = scmp.lt.s32.totalorder %s409_s23, %s1754_s16 }
 0x127   : > { %p1477_p7 = scmp.ne.s32.totalorder %s409_s23, %s1476_s15  ;;  %p1482_p10 = scmp.lt.s32.totalorder %s1778_s19, %s1476_s15 }
 0x129   : > { %p1483_p11 = por %p1482_p10, %p1481_p8 }
 0x12b   : > { %p1484_p12 = pnand %p1483_p11, %p1477_p7 }
 0x12d   : > { %1487 = shalt.err (!%p1484_p12)  }
 0x12e   : > { %411 = dma.hbm_to_vmem [thread:$0]  %s399_s28, 16, %s409_s23, [#allocation3] }
 0x12f   : > { %s429_s6 = sld [smem:[#allocation5 + %s428_s21]]  ;;  %s1067_s18 = sshll.u32 %s413_s10, 4 }
 0x130   : > { %s415_s30 = scalar_lea.hbm %s2069_s1, %s1067_s18  ;;  %s1651_s17 = smov [#allocation2 + $0xe]  }
 0x131   : > { %s440_s22 = sshll.u32 %s1651_s17, 4  ;;  %s1488_s8 = scalar_lea.hbm %s415_s30, 16  ;;  %s441_s22 = int_to_ptr.vmem [resolvable:$true] %s440_s22 }
 0x132   : > { %p1489_p0 = scmp.ne.s32.totalorder %s415_s30, %s1488_s8  ;;  %p1491_p1 = scmp.lt.s32.totalorder %s415_s30, %s2069_s1 }
 0x133   : > { %p1492_p2 = scmp.lt.s32.totalorder %s1769_s26, %s1488_s8 }
 0x135   : > { %p1493_p3 = por %p1492_p2, %p1491_p1 }
 0x137   : > { %p1494_p4 = pnand %p1493_p3, %p1489_p0 }
 0x139   : > { %1497 = shalt.err (!%p1494_p4)  }
 0x13a   : > { %s1498_s23 = scalar_lea.vmem %s1955_s20, 16  ;;  %p1503_p6 = scmp.lt.s32.totalorder %s1955_s20, %s1754_s16 }
 0x13b   : > { %p1499_p5 = scmp.ne.s32.totalorder %s1955_s20, %s1498_s23  ;;  %p1504_p7 = scmp.lt.s32.totalorder %s1778_s19, %s1498_s23 }
 0x13d   : > { %p1505_p8 = por %p1504_p7, %p1503_p6 }
 0x13f   : > { %p1506_p10 = pnand %p1505_p8, %p1499_p5 }
 0x141   : > { %1509 = shalt.err (!%p1506_p10)  }
 0x142   : > { %427 = dma.hbm_to_vmem [thread:$0]  %s415_s30, 16, %s1955_s20, [#allocation3] }
 0x143   : > { %s444_s10 = sadd.s32 15, %s1746_s12  ;;  %s1068_s28 = sshll.u32 %s429_s6, 4 }
 0x144   : > { %s445_s21 = sld [smem:[#allocation5 + %s444_s10]]  ;;  %s431_s18 = scalar_lea.hbm %s2069_s1, %s1068_s28 }
 0x145   : > { %s1652_s29 = smov [#allocation2 + $0xf]   ;;  %s1510_s17 = scalar_lea.hbm %s431_s18, 16 }
 0x146   : > { %s456_s0 = sshll.u32 %s1652_s29, 4  ;;  %p1511_p11 = scmp.ne.s32.totalorder %s431_s18, %s1510_s17  ;;  %s457_s0 = int_to_ptr.vmem [resolvable:$true] %s456_s0 }
 0x147   : > { %p1513_p12 = scmp.lt.s32.totalorder %s431_s18, %s2069_s1  ;;  %p1514_p0 = scmp.lt.s32.totalorder %s1769_s26, %s1510_s17 }
 0x149   : > { %p1515_p1 = por %p1514_p0, %p1513_p12 }
 0x14b   : > { %p1516_p2 = pnand %p1515_p1, %p1511_p11 }
 0x14d   : > { %1519 = shalt.err (!%p1516_p2)  }
 0x14e   : > { %s1520_s12 = scalar_lea.vmem %s441_s22, 16  ;;  %p1525_p4 = scmp.lt.s32.totalorder %s441_s22, %s1754_s16 }
 0x14f   : > { %p1521_p3 = scmp.ne.s32.totalorder %s441_s22, %s1520_s12  ;;  %p1526_p5 = scmp.lt.s32.totalorder %s1778_s19, %s1520_s12 }
 0x151   : > { %p1527_p6 = por %p1526_p5, %p1525_p4 }
 0x153   : > { %p1528_p7 = pnand %p1527_p6, %p1521_p3 }
 0x155   : > { %1531 = shalt.err (!%p1528_p7)  }
 0x156   : > { %443 = dma.hbm_to_vmem [thread:$0]  %s431_s18, 16, %s441_s22, [#allocation3] }
 0x157   : > { %s1069_s20 = sshll.u32 %s445_s21, 4 }
 0x158   : > { %s447_s9 = scalar_lea.hbm %s2069_s1, %s1069_s20 }
 0x159   : > { %s1532_s23 = scalar_lea.hbm %s447_s9, 16  ;;  %p1535_p10 = scmp.lt.s32.totalorder %s447_s9, %s2069_s1 }
 0x15a   : > { %p1533_p8 = scmp.ne.s32.totalorder %s447_s9, %s1532_s23  ;;  %p1536_p11 = scmp.lt.s32.totalorder %s1769_s26, %s1532_s23 }
 0x15c   : > { %p1537_p12 = por %p1536_p11, %p1535_p10 }
 0x15e   : > { %p1538_p0 = pnand %p1537_p12, %p1533_p8 }
 0x160   : > { %1541 = shalt.err (!%p1538_p0)  }
 0x161   : > { %s1542_s11 = scalar_lea.vmem %s457_s0, 16  ;;  %p1547_p2 = scmp.lt.s32.totalorder %s457_s0, %s1754_s16 }
 0x162   : > { %p1543_p1 = scmp.ne.s32.totalorder %s457_s0, %s1542_s11  ;;  %p1548_p3 = scmp.lt.s32.totalorder %s1778_s19, %s1542_s11 }
 0x164   : > { %p1549_p4 = por %p1548_p3, %p1547_p2 }
 0x166   : > { %p1550_p5 = pnand %p1549_p4, %p1543_p1 }
 0x168   : > { %1553 = shalt.err (!%p1550_p5)  }
 0x169   : > { %459 = dma.hbm_to_vmem [thread:$0]  %s447_s9, 16, %s457_s0, [#allocation3] }
 0x16a   : > { %s1996_s22 = scalar_lea.vmem [#allocation6], %s1750_s13 }
 0x16b   : > { %1606 = dma.done.wait [#allocation3], 256 }
 0x16c   : > { %1607 = vsyncadd [#allocation3], 4294967040  ;;  %v777_v0 = vld [vmem:[#allocation2] sm:$0xff]  ;;  %v778_v2 = vld [vmem:[#allocation2 + $0x8] sm:$0xff]  ;;  %s1111_s0 = sshll.u32 %s1626_s25, 8  ;;  %s845_s17 = sshll.u32 %s1996_s22, 4  ;;  %s2018_s17 = int_to_ptr.vmem [resolvable:$true] %s845_s17 }
 0x16d   : > { %v779_v1 = vld [vmem:[%s2070_s2] sm:$0xff]  ;;  %v780_v4 = vld [vmem:[%s2070_s2 + $0x8] sm:$0xff]  ;;  %s2016_s12 = scalar_lea.hbm %s2073_s5, %s1111_s0  ;;  %s2088_s20 = sand.u32 1, %s1618_s24  }
 0x16e   : > { %v781_v3 = vadd.f32 %v779_v1, %v777_v0  ;;  %v782_v5 = vadd.f32 %v780_v4, %v778_v2  ;;  %v1102_v24 = vld [vmem:[%s2071_s3] ss:$0 sm:$0xff]  ;;  %s2023_s6 = scalar_lea.sflag [#allocation7], %s2088_s20  ;;  %s1554_s30 = scalar_lea.vmem %s2018_s17, 256 }
 0x16f   : > { %v1103_v26 = vld [vmem:[%s2072_s4] ss:$0 sm:$0xff]  ;;  %p1555_p6 = scmp.ne.s32.totalorder %s2018_s17, %s1554_s30  ;;  %s1653_s25 = smov [#allocation6]  }
 0x170   : > { %783 = vadd.xlane.f32.xlu0 %v781_v3  ;;  %v790_v6 = vmul.f32 %v781_v3, %v781_v3  ;;  %v791_v7 = vmul.f32 %v782_v5, %v782_v5  ;;  %s1558_s9 = sshll.u32 %s1653_s25, 4  ;;  %s1559_s9 = int_to_ptr.vmem [resolvable:$false] %s1558_s9 }
 0x171   : > { %p1556_p7 = pnand %p1555_p6, %p1729_p9  ;;  %s1560_s23 = scalar_lea.vmem %s1559_s9, 512 }
 0x172   : > { %792 = vadd.xlane.f32.xlu1 %v790_v6  ;;  %p1561_p10 = scmp.lt.s32.totalorder %s2018_s17, %s1559_s9  ;;  %p1562_p11 = scmp.lt.s32.totalorder %s1560_s23, %s1554_s30 }
 0x173   : > { %p1557_p8 = pneg %p1556_p7 }
 0x174   : > { %785 = vadd.xlane.f32.xlu0 %v782_v5  ;;  %p1563_p12 = por %p1562_p11, %p1561_p10 }
 0x176   : > { %794 = vadd.xlane.f32.xlu1 %v791_v7  ;;  %p1564_p0 = pnand %p1563_p12, %p1557_p8 }
 0x1f9   : > { %v784_v8 = vpop.xlane.xlu0 %783 }
 0x1fa   : > { %v788_v9 = vmul.f32 0.0078125, %v784_v8 }
 0x1fb   : > { %v793_v10 = vpop.xlane.xlu1 %792 }
 0x1fc   : > { %v798_v11 = vmul.f32 %v788_v9, %v788_v9  ;;  %v796_v12 = vmul.f32 0.0078125, %v793_v10  ;;  %v806_v22 = vsub.f32 %v781_v3, %v788_v9 }
 0x1fd   : > { %v786_v13 = vpop.xlane.xlu0 %785 }
 0x1fe   : > { %v800_v14 = vsub.f32 %v796_v12, %v798_v11  ;;  %v789_v15 = vmul.f32 0.0078125, %v786_v13 }
 0x1ff   : > { %v795_v16 = vpop.xlane.xlu1 %794 }
 0x200   : > { %v802_v17 = vadd.f32 1e-12, %v800_v14  ;;  %v799_v18 = vmul.f32 %v789_v15, %v789_v15  ;;  %v797_v19 = vmul.f32 0.0078125, %v795_v16  ;;  %v807_v27 = vsub.f32 %v782_v5, %v789_v15 }
 0x202   : > { %1186 = vrsqrt.f32 %v802_v17  ;;  %v801_v20 = vsub.f32 %v797_v19, %v799_v18 }
 0x204   : > { %v803_v21 = vadd.f32 1e-12, %v801_v20 }
 0x206   : > { %1188 = vrsqrt.f32 %v803_v21 }
 0x20f   : > { %v1187_v23 = vpop.eup %1186 }
 0x210   : > { %v808_v25 = vmul.f32 %v1187_v23, %v806_v22 }
 0x212   : > { %v817_v28 = vmul.f32 %v1102_v24, %v808_v25 }
 0x213   : > { %v1189_v29 = vpop.eup %1188 }
 0x214   : > { %v809_v30 = vmul.f32 %v1189_v29, %v807_v27  ;;  %v826_v31 = vadd.f32 %v1103_v26, %v817_v28 }
 0x216   : > { %v818_v32 = vmul.f32 %v1102_v24, %v809_v30  ;;  %828 = vst [vmem:[%s1996_s22] sm:$0xff] %v826_v31 }
 0x218   : > { %v827_v33 = vadd.f32 %v1103_v26, %v818_v32 }
 0x21a   : > { %829 = vst [vmem:[%s1996_s22 + $0x8] sm:$0xff] %v827_v33 }
 0x21b   : > { %1567 = shalt.err (!%p1564_p0)
}
 0x21c   : > { %s1568_s10 = scalar_lea.hbm %s2016_s12, 256  ;;  %s1572_s22 = scalar_lea.hbm %s2073_s5, 512 }
 0x21d   : > { %p1569_p1 = scmp.ne.s32.totalorder %s2016_s12, %s1568_s10  ;;  %p1573_p4 = scmp.lt.s32.totalorder %s2016_s12, %s2073_s5 }
 0x21e   : > { %p1574_p5 = scmp.lt.s32.totalorder %s1572_s22, %s1568_s10 }
 0x21f   : > { %p1570_p2 = pnand %p1569_p1, %p1729_p9 }
 0x220   : > { %p1575_p6 = por %p1574_p5, %p1573_p4 }
 0x221   : > { %p1571_p3 = pneg %p1570_p2 }
 0x223   : > { %p1576_p7 = pnand %p1575_p6, %p1571_p3 }
 0x225   : > { %1579 = shalt.err (!%p1576_p7)
}
 0x226   : > { %s1654_s15 = smov 128   ;;  %s1655_s18 = smov 8  }
 0x227   : > { %1112 = dma.vmem_to_hbm [thread:$0]  (%p1729_p9), %s2018_s17, 256, %s2016_s12, %s2023_s6, %s1654_s15, %s1654_s15, %s1655_s18  }
 0x228 PF: > { %s2089_s13 = sld [smem:[#allocation77_spill]]  ;;  %p1118_p8 = scmp.ge.s32.totalorder %s1634_s27, 2 }
 0x22a   : > { %p1115_p10 = pnand %p1118_p8, %p1736_p13 }
 0x22c   : > { %p1116_p11 = pneg %p1115_p10 }
 0x22e   : > { %s860_s19 = sand.u32 1, %s2089_s13  }
 0x22f   : > { %s861_s29 = scalar_lea.sflag [#allocation7], %s860_s19 }
 0x230   : > { %1609 = dma.done.wait (%p1116_p11), %s861_s29, 256  }
 0x231   : > { %1611 = vsyncadd (%p1116_p11), %s861_s29, 4294967040  ;;  %s24_s27 = sadd.s32 1, %s1634_s27   ;;  %s2091_s0 = sld [smem:[#allocation78_spill]] }
 0x232   : > { %p21_p12 = scmp.ge.s32.totalorder %s24_s27, 4   ;;  %s2092_s8 = sld [smem:[#allocation82_spill]] }
 0x233   : > { %s2093_s25 = sld [smem:[#allocation79_spill]]  ;;  %s2095_s23 = smov %s1618_s24 }
 0x234   : > { %s2094_s26 = sld [smem:[#allocation80_spill]]  ;;  %23 = sbr.rel (!%p21_p12) target bundleno = 19 (0x13), region = 270 }
 0x237   : > { %s2096_s24 = smov %s2091_s0 }
 0x238   : > { %s2097_s0 = smov %s2092_s8 }
 0x239   :  { %866 = vsyncpa [#allocation7], 1 }
 0x23a   :  { %868 = vsyncpa [#allocation7 + $0x1], 1 }
 0x23b   :  { %869 = vsyncmov [#allocation3] }
 0x23e   :  { %s870_s7 = vpop.sfrf %869 }
 0x23f   :  { %p1109_p9 = scmp.ne.s32.totalorder %s870_s7, 0 }
 0x241   :  { %874 = shalt.err (%p1109_p9)  }
 0x242   :  { %876 = vsyncmov [#allocation3 + $0x1] }
 0x245   :  { %s877_s17 = vpop.sfrf %876 }
 0x246   :  { %p1110_p13 = scmp.ne.s32.totalorder %s877_s17, 0 }
 0x248   :  { %881 = shalt.err (%p1110_p13)  }

</bundles_post_ra>
